<compile_context>
chip_gen: v5e
topology: v5e:2x2
jax: 0.10.0
libtpu: 0.0.40
codegen_flags: <defaults>
</compile_context>

<pallas_src>
import functools

import jax
import jax.numpy as jnp
from jax.experimental import pallas as pl
from jax.experimental.pallas import tpu as pltpu


def _device_kind():
    try:
        return jax.devices()[0].device_kind.lower()
    except Exception:
        return ""


def _is_v5e(kind):
    return ("v5 lite" in kind) or ("v5e" in kind) or ("v5lite" in kind)


def _auto_block_b(B, T, E, A, KW, kind):
    """Largest batch tile (B or a multiple of 8) whose working set fits ~24 MiB VMEM."""
    per_row = (2 * T * E * 2        # enc bf16 tile, double-buffered
               + 2 * T * A * 4      # (optional) cached pre_enc f32 tile, double-buffered
               + 2 * T * KW * 4     # conv-taps f32 tile, double-buffered
               + 4 * T * A * 4      # live f32 temporaries (att_conv, tanh, sums)
               + 16 * T * 4)        # assorted (T,) rows / mask / outputs
    budget = 24 * 1024 * 1024       # headroom inside the 32 MiB scoped-VMEM limit (v7x-safe)
    candidates = [B] + list(range(((B - 1) // 8) * 8, 0, -8))
    # v7x has two TensorCores: prefer >= 2 (even) batch blocks so "parallel" can split them.
    if "v7" in kind and B >= 16 and B % 16 == 0:
        halved = [c for c in candidates if 2 * c <= B]
        if halved:
            candidates = halved
    for c in candidates:
        if c * per_row <= budget:
            return c
    return candidates[-1]


def _att_forward_kernel(*refs, scaling, use_precomputed_pre_enc, context_on_mxu):
    c_ref, w_ref = refs[-2], refs[-1]
    if use_precomputed_pre_enc:
        (pre_ref, enc_ref, dec_ref, taps_ref, aps_ref, len_ref,
         wdec_ref, fused_ref, wg_ref) = refs[:-2]
    else:
        (enc_ref, dec_ref, taps_ref, aps_ref, len_ref,
         wenc_ref, benc_ref, wdec_ref, fused_ref, wg_ref) = refs[:-2]

    TB, T, E = enc_ref.shape
    KW, A = fused_ref.shape

    enc = enc_ref[...]                                        # (TB, T, E) bf16 (cached)

    if use_precomputed_pre_enc:
        # pre_compute_enc_h cached once per utterance (ESPnet semantics).
        pre_enc = pre_ref[...]                                # (TB, T, A) f32
    else:
        # Recompute on the MXU from the cached bf16 enc (no per-step HBM convert).
        pre_enc = jnp.dot(enc.reshape(TB * T, E), wenc_ref[...],
                          preferred_element_type=jnp.float32).reshape(TB, T, A)
        pre_enc = pre_enc + benc_ref[...][None, :, :]

    # mlp_dec(dec_z).unsqueeze(1) -> (TB, 1, A)   (no bias)
    dec_tiled = jnp.dot(dec_ref[...], wdec_ref[...],
                        preferred_element_type=jnp.float32)[:, None, :]

    # loc_conv + mlp_att fused into ONE small MXU matmul:
    #   att_conv = taps (TB*T, KW) @ fused (KW, A)
    att_conv = jnp.dot(taps_ref[...].reshape(TB * T, KW), fused_ref[...],
                       preferred_element_type=jnp.float32).reshape(TB, T, A)

    # e = gvec(tanh(pre_enc + dec_tiled + att_conv)).squeeze(-1)
    # (gvec bias folded out: softmax is shift-invariant, so it cannot affect c or w)
    th = jnp.tanh(pre_enc + dec_tiled + att_conv)
    e = jnp.sum(th * wg_ref[...][None, :, :], axis=-1)        # (TB, T)

    # masked softmax over time (mask after scaling, finite fill -> NaN-free)
    se = scaling * e
    tids = jax.lax.broadcasted_iota(jnp.int32, (TB, T), 1)
    se = jnp.where(tids >= len_ref[...], -1e30, se)
    m = jnp.max(se, axis=1, keepdims=True)
    p = jnp.exp(se - m)
    w_soft = p * pl.reciprocal(jnp.sum(p, axis=1, keepdims=True), approx=True)

    # forward-attention recombination, clamp, L1 renormalize
    w = aps_ref[...] * w_soft                                 # (att_prev + shift) * softmax
    w = jnp.maximum(w, 1e-6)
    denom = jnp.maximum(jnp.sum(w, axis=1, keepdims=True), 1e-12)
    w = w * pl.reciprocal(denom, approx=True)
    w_ref[...] = w

    # c[b,:] = sum_t w[b,t] * enc[b,t,:]   (w kept f32 for accuracy of c)
    if context_on_mxu:
        c3 = jnp.einsum("bqt,bte->bqe", w[:, None, :], enc.astype(jnp.float32),
                        preferred_element_type=jnp.float32)
        c_ref[...] = c3.reshape(TB, E)
    else:
        c_ref[...] = jnp.sum(enc.astype(jnp.float32) * w[:, :, None], axis=1)

    # TODO(synk): monotonic attention constraint (last_attended_idx) path not
    # implemented; the default forward call uses last_attended_idx=None.


def precompute_enc_state(enc_hs_pad, params):
    """One-time (per utterance) work: bf16 cast of enc and cached pre_compute_enc_h.

    Mirrors ESPnet's caching of `pre_compute_enc_h`: call once and reuse across
    decoder steps so the bf16 convert / enc projection are never paid per step.
    """
    enc_b = enc_hs_pad.astype(jnp.bfloat16)
    pre_enc = (jnp.einsum("bte,ea->bta", enc_b,
                          params["w_enc"].astype(jnp.bfloat16),
                          preferred_element_type=jnp.float32)
               + params["b_enc"].reshape(1, 1, -1).astype(jnp.float32))
    return {"enc_b": enc_b, "pre_enc": pre_enc}


def att_forward(enc_hs_pad, enc_hs_len, dec_z, att_prev, params, scaling=1.0,
                block_b=None, enc_state=None, use_precomputed_pre_enc=None,
                context_on_mxu=None):
    """Pallas implementation of AttForward.forward (default path).

    Notes:
      * rows with enc_hs_len == 0 get a uniform masked softmax; outputs stay
        finite (clamp + renorm) but are semantically arbitrary, as in PyTorch.
      * if B is not a multiple of block_b the trailing block is clamped and a few
        batch rows are recomputed (correct, slightly wasted work).
    """
    B, T, E = enc_hs_pad.shape
    _, KW = params["w_conv"].shape
    K = (KW - 1) // 2
    A = params["w_enc"].shape[1]
    Du = params["w_dec"].shape[0]
    kind = _device_kind()

    if dec_z is None:
        dec_z = jnp.zeros((B, Du), jnp.float32)
    dec_z = dec_z.reshape(B, Du)
    if att_prev is None:
        att_prev = jnp.zeros((B, T), jnp.float32).at[:, 0].set(1.0)
    att_prev = att_prev.astype(jnp.float32)

    if enc_state is None:
        enc_state = precompute_enc_state(enc_hs_pad, params)
    if use_precomputed_pre_enc is None:
        # pre_enc caching is a clear win on v5e for E >= ~128; elsewhere recompute on MXU.
        use_precomputed_pre_enc = _is_v5e(kind) and E >= 128
    if context_on_mxu is None:
        # q=1 rows starve the MXU; use the VPU reduce for small E and on v5e.
        context_on_mxu = (E >= 128) and not _is_v5e(kind)

    if block_b is None:
        block_b = _auto_block_b(B, T, E, A, KW, kind)
    if block_b != B and block_b % 8 != 0:
        raise ValueError("block_b must equal B or be a multiple of 8")
    nb = pl.cdiv(B, block_b)

    # Per-step host-side prep (tiny): conv tap stack, att_prev + shift, lengths.
    att_pad = jnp.pad(att_prev, ((0, 0), (K, K)))
    taps = jnp.stack([att_pad[:, k:k + T] for k in range(KW)], axis=-1)   # (B, T, KW)
    shift = jnp.pad(att_prev, ((0, 0), (1, 0)))[:, :-1]
    aps = att_prev + shift                                                # (B, T)
    lens = jnp.asarray(enc_hs_len, jnp.int32).reshape(B, 1)

    # Fold loc_conv into mlp_att once: (KW, C) @ (C, A) -> (KW, A).
    fused = (params["w_conv"].T.astype(jnp.float32)
             @ params["w_att"].astype(jnp.float32))

    enc_b = enc_state["enc_b"]
    dec_b = dec_z.astype(jnp.bfloat16)
    wdec_b = params["w_dec"].astype(jnp.bfloat16)
    wg = params["w_gvec"].reshape(1, A).astype(jnp.float32)
    # params["b_gvec"] intentionally unused: constant logit shift, softmax-invariant.

    kernel = functools.partial(
        _att_forward_kernel, scaling=float(scaling),
        use_precomputed_pre_enc=bool(use_precomputed_pre_enc),
        context_on_mxu=bool(context_on_mxu))

    row = lambda i: (i, 0)
    row3 = lambda i: (i, 0, 0)
    rep = lambda i: (0, 0)

    if use_precomputed_pre_enc:
        args = (enc_state["pre_enc"], enc_b, dec_b, taps, aps, lens, wdec_b, fused, wg)
        in_specs = [
            pl.BlockSpec((block_b, T, A), row3),          # cached pre_enc (f32)
            pl.BlockSpec((block_b, T, E), row3),          # enc (bf16, cached)
            pl.BlockSpec((block_b, Du), row),             # dec_z (bf16)
            pl.BlockSpec((block_b, T, KW), row3),         # conv taps (f32)
            pl.BlockSpec((block_b, T), row),              # att_prev + shift (f32)
            pl.BlockSpec((block_b, 1), row),              # lengths (i32)
            pl.BlockSpec((Du, A), rep),                   # w_dec (bf16)
            pl.BlockSpec((KW, A), rep),                   # fused conv@att (f32)
            pl.BlockSpec((1, A), rep),                    # gvec weight (f32)
        ]
    else:
        wenc_b = params["w_enc"].astype(jnp.bfloat16)
        benc = params["b_enc"].reshape(1, A).astype(jnp.float32)
        args = (enc_b, dec_b, taps, aps, lens, wenc_b, benc, wdec_b, fused, wg)
        in_specs = [
            pl.BlockSpec((block_b, T, E), row3),          # enc (bf16, cached)
            pl.BlockSpec((block_b, Du), row),             # dec_z (bf16)
            pl.BlockSpec((block_b, T, KW), row3),         # conv taps (f32)
            pl.BlockSpec((block_b, T), row),              # att_prev + shift (f32)
            pl.BlockSpec((block_b, 1), row),              # lengths (i32)
            pl.BlockSpec((E, A), rep),                    # w_enc (bf16)
            pl.BlockSpec((1, A), rep),                    # b_enc (f32)
            pl.BlockSpec((Du, A), rep),                   # w_dec (bf16)
            pl.BlockSpec((KW, A), rep),                   # fused conv@att (f32)
            pl.BlockSpec((1, A), rep),                    # gvec weight (f32)
        ]

    c, w = pl.pallas_call(
        kernel,
        out_shape=(jax.ShapeDtypeStruct((B, E), jnp.float32),
                   jax.ShapeDtypeStruct((B, T), jnp.float32)),
        grid=(nb,),
        in_specs=in_specs,
        out_specs=(pl.BlockSpec((block_b, E), row),
                   pl.BlockSpec((block_b, T), row)),
        compiler_params=pltpu.CompilerParams(
            dimension_semantics=("parallel",),
            vmem_limit_bytes=32 * 1024 * 1024),
    )(*args)
    return c, w


def att_forward_ref_fp32(enc, lens, dec_z, att_prev, params, scaling=1.0):
    """Pure-JAX fp32 reference mirroring the PyTorch module."""
    B, T, E = enc.shape
    _, KW = params["w_conv"].shape
    K = (KW - 1) // 2
    pre_enc = jnp.einsum("bte,ea->bta", enc, params["w_enc"]) + params["b_enc"][None]
    dec_tiled = (dec_z @ params["w_dec"])[:, None, :]
    att_pad = jnp.pad(att_prev, ((0, 0), (K, K)))
    taps = jnp.stack([att_pad[:, k:k + T] for k in range(KW)], axis=-1)   # (B,T,KW)
    conv_out = taps @ params["w_conv"].T                                  # (B,T,C)
    att_conv = conv_out @ params["w_att"]                                 # (B,T,A)
    e = jnp.einsum("bta,a->bt", jnp.tanh(pre_enc + dec_tiled + att_conv),
                   params["w_gvec"][0]) + params["b_gvec"][0, 0]
    mask = jnp.arange(T)[None, :] >= lens[:, None]
    e = jnp.where(mask, -jnp.inf, e)
    w = jax.nn.softmax(scaling * e, axis=1)
    shift = jnp.pad(att_prev, ((0, 0), (1, 0)))[:, :-1]
    w = (att_prev + shift) * w
    w = jnp.maximum(w, 1e-6)
    w = w / jnp.maximum(jnp.sum(w, axis=1, keepdims=True), 1e-12)
    c = jnp.sum(enc * w[:, :, None], axis=1)
    return c, w


def att_forward_ref_mixed(enc, lens, dec_z, att_prev, params, scaling=1.0):
    """Pure-JAX reference applying the same bf16 casts / fused weights as the kernel."""
    B, T, E = enc.shape
    _, KW = params["w_conv"].shape
    K = (KW - 1) // 2
    enc_b = enc.astype(jnp.bfloat16)
    pre_enc = jnp.einsum("bte,ea->bta", enc_b, params["w_enc"].astype(jnp.bfloat16),
                         preferred_element_type=jnp.float32) + params["b_enc"][None]
    dec_tiled = jnp.dot(dec_z.astype(jnp.bfloat16),
                        params["w_dec"].astype(jnp.bfloat16),
                        preferred_element_type=jnp.float32)[:, None, :]
    fused = params["w_conv"].T @ params["w_att"]                          # (KW, A)
    att_pad = jnp.pad(att_prev, ((0, 0), (K, K)))
    taps = jnp.stack([att_pad[:, k:k + T] for k in range(KW)], axis=-1)   # (B,T,KW)
    att_conv = jnp.einsum("btk,ka->bta", taps, fused)
    e = jnp.sum(jnp.tanh(pre_enc + dec_tiled + att_conv) *
                params["w_gvec"][None], axis=-1)                          # gvec bias folded out
    se = scaling * e
    mask = jnp.arange(T)[None, :] >= lens[:, None]
    se = jnp.where(mask, -1e30, se)
    w = jax.nn.softmax(se, axis=1)
    shift = jnp.pad(att_prev, ((0, 0), (1, 0)))[:, :-1]
    w = (att_prev + shift) * w
    w = jnp.maximum(w, 1e-6)
    w = w / jnp.maximum(jnp.sum(w, axis=1, keepdims=True), 1e-12)
    c = jnp.einsum("bt,bte->be", w, enc_b.astype(jnp.float32))            # w kept f32
    return c, w


if __name__ == "__main__":
    B, T = 16, 16
    eprojs, dunits, att_dim = 32, 32, 32
    aconv_chans, aconv_filts = 4, 3

    key = jax.random.PRNGKey(0)
    keys = jax.random.split(key, 11)

    enc_hs_pad = jax.random.normal(keys[0], (B, T, eprojs), jnp.float32)
    dec_z = jax.random.normal(keys[1], (B, dunits), jnp.float32)
    att_prev = jax.nn.softmax(jax.random.normal(keys[2], (B, T), jnp.float32), axis=1)
    enc_hs_len = jax.random.randint(keys[10], (B,), 1, T + 1).astype(jnp.int32)
    enc_hs_len = enc_hs_len.at[0].set(T)

    params = {
        "w_enc":  0.1 * jax.random.normal(keys[3], (eprojs, att_dim), jnp.float32),
        "b_enc":  0.1 * jax.random.normal(keys[4], (1, att_dim), jnp.float32),
        "w_dec":  0.1 * jax.random.normal(keys[5], (dunits, att_dim), jnp.float32),
        "w_att":  0.1 * jax.random.normal(keys[6], (aconv_chans, att_dim), jnp.float32),
        "w_conv": 0.1 * jax.random.normal(keys[7], (aconv_chans, 2 * aconv_filts + 1),
                                          jnp.float32),
        "w_gvec": 0.1 * jax.random.normal(keys[8], (1, att_dim), jnp.float32),
        "b_gvec": 0.1 * jax.random.normal(keys[9], (1, 1), jnp.float32),
    }

    # One-time per-utterance state (cached across decoder steps, like ESPnet).
    enc_state = precompute_enc_state(enc_hs_pad, params)

    c_m, w_m = att_forward_ref_mixed(enc_hs_pad, enc_hs_len, dec_z, att_prev, params, 1.0)
    c_f, w_f = att_forward_ref_fp32(enc_hs_pad, enc_hs_len, dec_z, att_prev, params, 1.0)

    def check(c, w, tag):
        assert c.shape == (B, eprojs) and w.shape == (B, T), tag
        assert bool(jnp.all(jnp.isfinite(c))) and bool(jnp.all(jnp.isfinite(w))), tag
        # Tight check vs a reference with identical bf16 casts / fused weights
        # (slack covers the EUP approximate reciprocals used in the kernel).
        assert jnp.allclose(w, w_m, rtol=5e-3, atol=1e-3), \
            (tag, float(jnp.max(jnp.abs(w - w_m))))
        assert jnp.allclose(c, c_m, rtol=1e-2, atol=2e-3), \
            (tag, float(jnp.max(jnp.abs(c - c_m))))
        # Loose check vs the full-fp32 PyTorch-equivalent reference.
        assert jnp.allclose(w, w_f, rtol=5e-2, atol=1e-2), \
            (tag, float(jnp.max(jnp.abs(w - w_f))))
        assert jnp.allclose(c, c_f, rtol=5e-2, atol=1e-2), \
            (tag, float(jnp.max(jnp.abs(c - c_f))))

    # 1) Auto configuration (block_b / pre_enc caching / context path picked per device).
    c, w = att_forward(enc_hs_pad, enc_hs_len, dec_z, att_prev, params,
                       scaling=1.0, enc_state=enc_state)
    jax.block_until_ready((c, w))
    check(c, w, "auto")

    # 2) Cached pre_enc + MXU context + two batch blocks (v7x-style dual-TC split).
    c2, w2 = att_forward(enc_hs_pad, enc_hs_len, dec_z, att_prev, params,
                         scaling=1.0, enc_state=enc_state, block_b=8,
                         use_precomputed_pre_enc=True, context_on_mxu=True)
    jax.block_until_ready((c2, w2))
    check(c2, w2, "pre_enc+mxu")

    # 3) In-kernel enc projection + VPU context, single grid step.
    c3, w3 = att_forward(enc_hs_pad, enc_hs_len, dec_z, att_prev, params,
                         scaling=1.0, enc_state=enc_state, block_b=B,
                         use_precomputed_pre_enc=False, context_on_mxu=False)
    jax.block_until_ready((c3, w3))
    check(c3, w3, "recompute+vpu")

    print("KERNEL_OK")
</pallas_src>

<mosaic_0001>
module attributes {stable_mosaic.version = 11 : i64} {
  func.func @_att_forward_kernel(%arg0: i32, %arg1: memref<16x16x32xbf16, #tpu.memory_space<vmem>>, %arg2: memref<16x32xbf16, #tpu.memory_space<vmem>>, %arg3: memref<16x16x7xf32, #tpu.memory_space<vmem>>, %arg4: memref<16x16xf32, #tpu.memory_space<vmem>>, %arg5: memref<16x1xi32, #tpu.memory_space<vmem>>, %arg6: memref<32x32xbf16, #tpu.memory_space<vmem>>, %arg7: memref<1x32xf32, #tpu.memory_space<vmem>>, %arg8: memref<32x32xbf16, #tpu.memory_space<vmem>>, %arg9: memref<7x32xf32, #tpu.memory_space<vmem>>, %arg10: memref<1x32xf32, #tpu.memory_space<vmem>>, %arg11: memref<16x32xf32, #tpu.memory_space<vmem>>, %arg12: memref<16x16xf32, #tpu.memory_space<vmem>>) attributes {dimension_semantics = [#tpu.dimension_semantics<parallel>], iteration_bounds = array<i64: 1>, scalar_prefetch = 0 : i64, scratch_operands = 0 : i64, tpu.core_type = #tpu.core_type<tc>, window_params = [{transform_indices = @transform_0, window_bounds = array<i64: 16, 16, 32>}, {transform_indices = @transform_1, window_bounds = array<i64: 16, 32>}, {transform_indices = @transform_2, window_bounds = array<i64: 16, 16, 7>}, {transform_indices = @transform_3, window_bounds = array<i64: 16, 16>}, {transform_indices = @transform_4, window_bounds = array<i64: 16, 1>}, {pipeline_mode = #tpu.pipeline_mode<synchronous>, transform_indices = @transform_5, window_bounds = array<i64: 32, 32>}, {pipeline_mode = #tpu.pipeline_mode<synchronous>, transform_indices = @transform_6, window_bounds = array<i64: 1, 32>}, {pipeline_mode = #tpu.pipeline_mode<synchronous>, transform_indices = @transform_7, window_bounds = array<i64: 32, 32>}, {pipeline_mode = #tpu.pipeline_mode<synchronous>, transform_indices = @transform_8, window_bounds = array<i64: 7, 32>}, {pipeline_mode = #tpu.pipeline_mode<synchronous>, transform_indices = @transform_9, window_bounds = array<i64: 1, 32>}, {transform_indices = @transform_10, window_bounds = array<i64: 16, 32>}, {transform_indices = @transform_11, window_bounds = array<i64: 16, 16>}]} {
    %c0 = arith.constant 0 : index
    %c0_0 = arith.constant 0 : index
    %c0_1 = arith.constant 0 : index
    %0 = vector.load %arg1[%c0, %c0_0, %c0_1] : memref<16x16x32xbf16, #tpu.memory_space<vmem>>, vector<16x16x32xbf16>
    %1 = vector.shape_cast %0 : vector<16x16x32xbf16> to vector<256x32xbf16>
    %c0_2 = arith.constant 0 : index
    %c0_3 = arith.constant 0 : index
    %2 = vector.load %arg6[%c0_2, %c0_3] : memref<32x32xbf16, #tpu.memory_space<vmem>>, vector<32x32xbf16>
    %cst = arith.constant dense<0.000000e+00> : vector<256x32xf32>
    %3 = tpu.matmul %1, %2, %cst {dimension_numbers = #tpu.dot_dimension_numbers<[1], [0], [0], [1], [0, 0, 1, 1], [], []>} : vector<256x32xbf16>, vector<32x32xbf16>, vector<256x32xf32> -> vector<256x32xf32>
    %4 = vector.shape_cast %3 : vector<256x32xf32> to vector<16x16x32xf32>
    %c0_4 = arith.constant 0 : index
    %c0_5 = arith.constant 0 : index
    %5 = vector.load %arg7[%c0_4, %c0_5] : memref<1x32xf32, #tpu.memory_space<vmem>>, vector<1x32xf32>
    %6 = vector.shape_cast %5 : vector<1x32xf32> to vector<1x1x32xf32>
    %7 = vector.broadcast %6 : vector<1x1x32xf32> to vector<16x16x32xf32>
    %8 = arith.addf %4, %7 : vector<16x16x32xf32>
    %c0_6 = arith.constant 0 : index
    %c0_7 = arith.constant 0 : index
    %9 = vector.load %arg2[%c0_6, %c0_7] : memref<16x32xbf16, #tpu.memory_space<vmem>>, vector<16x32xbf16>
    %c0_8 = arith.constant 0 : index
    %c0_9 = arith.constant 0 : index
    %10 = vector.load %arg8[%c0_8, %c0_9] : memref<32x32xbf16, #tpu.memory_space<vmem>>, vector<32x32xbf16>
    %cst_10 = arith.constant dense<0.000000e+00> : vector<16x32xf32>
    %11 = tpu.matmul %9, %10, %cst_10 {dimension_numbers = #tpu.dot_dimension_numbers<[1], [0], [0], [1], [0, 0, 1, 1], [], []>} : vector<16x32xbf16>, vector<32x32xbf16>, vector<16x32xf32> -> vector<16x32xf32>
    %12 = vector.shape_cast %11 : vector<16x32xf32> to vector<16x1x32xf32>
    %c0_11 = arith.constant 0 : index
    %c0_12 = arith.constant 0 : index
    %c0_13 = arith.constant 0 : index
    %13 = vector.load %arg3[%c0_11, %c0_12, %c0_13] : memref<16x16x7xf32, #tpu.memory_space<vmem>>, vector<16x16x7xf32>
    %14 = vector.shape_cast %13 : vector<16x16x7xf32> to vector<256x7xf32>
    %c0_14 = arith.constant 0 : index
    %c0_15 = arith.constant 0 : index
    %15 = vector.load %arg9[%c0_14, %c0_15] : memref<7x32xf32, #tpu.memory_space<vmem>>, vector<7x32xf32>
    %cst_16 = arith.constant dense<0.000000e+00> : vector<256x32xf32>
    %16 = tpu.matmul %14, %15, %cst_16 {dimension_numbers = #tpu.dot_dimension_numbers<[1], [0], [0], [1], [0, 0, 1, 1], [], []>} : vector<256x7xf32>, vector<7x32xf32>, vector<256x32xf32> -> vector<256x32xf32>
    %17 = vector.shape_cast %16 : vector<256x32xf32> to vector<16x16x32xf32>
    %18 = vector.broadcast %12 : vector<16x1x32xf32> to vector<16x16x32xf32>
    %19 = arith.addf %8, %18 : vector<16x16x32xf32>
    %20 = arith.addf %19, %17 : vector<16x16x32xf32>
    %21 = math.tanh %20 : vector<16x16x32xf32>
    %c0_17 = arith.constant 0 : index
    %c0_18 = arith.constant 0 : index
    %22 = vector.load %arg10[%c0_17, %c0_18] : memref<1x32xf32, #tpu.memory_space<vmem>>, vector<1x32xf32>
    %23 = vector.shape_cast %22 : vector<1x32xf32> to vector<1x1x32xf32>
    %24 = vector.broadcast %23 : vector<1x1x32xf32> to vector<16x16x32xf32>
    %25 = arith.mulf %21, %24 : vector<16x16x32xf32>
    %cst_19 = arith.constant dense<0.000000e+00> : vector<16x16xf32>
    %26 = vector.multi_reduction <add>, %25, %cst_19 [2] : vector<16x16x32xf32> to vector<16x16xf32>
    %cst_20 = arith.constant 1.000000e+00 : f32
    %27 = vector.broadcast %cst_20 : f32 to vector<16x16xf32>
    %28 = arith.mulf %27, %26 : vector<16x16xf32>
    %29 = tpu.iota {dimensions = array<i32: 1>} : vector<16x16xi32>
    %c0_21 = arith.constant 0 : index
    %c0_22 = arith.constant 0 : index
    %30 = vector.load %arg5[%c0_21, %c0_22] : memref<16x1xi32, #tpu.memory_space<vmem>>, vector<16x1xi32>
    %31 = vector.broadcast %30 : vector<16x1xi32> to vector<16x16xi32>
    %32 = arith.cmpi sge, %29, %31 : vector<16x16xi32>
    %cst_23 = arith.constant -1.000000e+30 : f32
    %33 = vector.broadcast %cst_23 : f32 to vector<16x16xf32>
    %34 = arith.select %32, %33, %28 : vector<16x16xi1>, vector<16x16xf32>
    %cst_24 = arith.constant dense<0xFF800000> : vector<16xf32>
    %35 = vector.multi_reduction <maximumf>, %34, %cst_24 [1] : vector<16x16xf32> to vector<16xf32>
    %36 = vector.shape_cast %35 : vector<16xf32> to vector<16x1xf32>
    %37 = vector.broadcast %36 : vector<16x1xf32> to vector<16x16xf32>
    %38 = arith.subf %34, %37 : vector<16x16xf32>
    %39 = math.exp %38 : vector<16x16xf32>
    %cst_25 = arith.constant dense<0.000000e+00> : vector<16xf32>
    %40 = vector.multi_reduction <add>, %39, %cst_25 [1] : vector<16x16xf32> to vector<16xf32>
    %41 = vector.shape_cast %40 : vector<16xf32> to vector<16x1xf32>
    %42 = tpu.reciprocal %41 {approx = true} : vector<16x1xf32> -> vector<16x1xf32>
    %43 = vector.broadcast %42 : vector<16x1xf32> to vector<16x16xf32>
    %44 = arith.mulf %39, %43 : vector<16x16xf32>
    %c0_26 = arith.constant 0 : index
    %c0_27 = arith.constant 0 : index
    %45 = vector.load %arg4[%c0_26, %c0_27] : memref<16x16xf32, #tpu.memory_space<vmem>>, vector<16x16xf32>
    %46 = arith.mulf %45, %44 : vector<16x16xf32>
    %cst_28 = arith.constant 9.99999997E-7 : f32
    %47 = vector.broadcast %cst_28 : f32 to vector<16x16xf32>
    %48 = arith.maximumf %46, %47 : vector<16x16xf32>
    %cst_29 = arith.constant dense<0.000000e+00> : vector<16xf32>
    %49 = vector.multi_reduction <add>, %48, %cst_29 [1] : vector<16x16xf32> to vector<16xf32>
    %50 = vector.shape_cast %49 : vector<16xf32> to vector<16x1xf32>
    %cst_30 = arith.constant 9.99999996E-13 : f32
    %51 = vector.broadcast %cst_30 : f32 to vector<16x1xf32>
    %52 = arith.maximumf %50, %51 : vector<16x1xf32>
    %53 = tpu.reciprocal %52 {approx = true} : vector<16x1xf32> -> vector<16x1xf32>
    %54 = vector.broadcast %53 : vector<16x1xf32> to vector<16x16xf32>
    %55 = arith.mulf %48, %54 : vector<16x16xf32>
    %c0_31 = arith.constant 0 : index
    %c0_32 = arith.constant 0 : index
    %56 = vector.load %arg12[%c0_31, %c0_32] : memref<16x16xf32, #tpu.memory_space<vmem>>, vector<16x16xf32>
    tpu.vector_store %arg12[%c0_31, %c0_32], %55 {strides = array<i32>} : memref<16x16xf32, #tpu.memory_space<vmem>>, vector<16x16xf32>,
    %57 = arith.extf %0 : vector<16x16x32xbf16> to vector<16x16x32xf32>
    %58 = vector.shape_cast %55 : vector<16x16xf32> to vector<16x16x1xf32>
    %59 = vector.broadcast %58 : vector<16x16x1xf32> to vector<16x16x32xf32>
    %60 = arith.mulf %57, %59 : vector<16x16x32xf32>
    %cst_33 = arith.constant dense<0.000000e+00> : vector<16x32xf32>
    %61 = vector.multi_reduction <add>, %60, %cst_33 [1] : vector<16x16x32xf32> to vector<16x32xf32>
    %c0_34 = arith.constant 0 : index
    %c0_35 = arith.constant 0 : index
    %62 = vector.load %arg11[%c0_34, %c0_35] : memref<16x32xf32, #tpu.memory_space<vmem>>, vector<16x32xf32>
    tpu.vector_store %arg11[%c0_34, %c0_35], %61 {strides = array<i32>} : memref<16x32xf32, #tpu.memory_space<vmem>>, vector<16x32xf32>,
    return
  }
  func.func @transform_0(%arg0: i32) -> (i32, i32, i32) {
    %c0_i32 = arith.constant 0 : i32
    %c0_i32_0 = arith.constant 0 : i32
    %c0_i32_1 = arith.constant 0 : i32
    return %arg0, %c0_i32, %c0_i32_0 : i32, i32, i32
  }
  func.func @transform_1(%arg0: i32) -> (i32, i32) {
    %c0_i32 = arith.constant 0 : i32
    %c0_i32_0 = arith.constant 0 : i32
    return %arg0, %c0_i32 : i32, i32
  }
  func.func @transform_2(%arg0: i32) -> (i32, i32, i32) {
    %c0_i32 = arith.constant 0 : i32
    %c0_i32_0 = arith.constant 0 : i32
    %c0_i32_1 = arith.constant 0 : i32
    return %arg0, %c0_i32, %c0_i32_0 : i32, i32, i32
  }
  func.func @transform_3(%arg0: i32) -> (i32, i32) {
    %c0_i32 = arith.constant 0 : i32
    %c0_i32_0 = arith.constant 0 : i32
    return %arg0, %c0_i32 : i32, i32
  }
  func.func @transform_4(%arg0: i32) -> (i32, i32) {
    %c0_i32 = arith.constant 0 : i32
    %c0_i32_0 = arith.constant 0 : i32
    return %arg0, %c0_i32 : i32, i32
  }
  func.func @transform_5(%arg0: i32) -> (i32, i32) {
    %c0_i32 = arith.constant 0 : i32
    %c0_i32_0 = arith.constant 0 : i32
    %c0_i32_1 = arith.constant 0 : i32
    return %c0_i32, %c0_i32_0 : i32, i32
  }
  func.func @transform_6(%arg0: i32) -> (i32, i32) {
    %c0_i32 = arith.constant 0 : i32
    %c0_i32_0 = arith.constant 0 : i32
    %c0_i32_1 = arith.constant 0 : i32
    return %c0_i32, %c0_i32_0 : i32, i32
  }
  func.func @transform_7(%arg0: i32) -> (i32, i32) {
    %c0_i32 = arith.constant 0 : i32
    %c0_i32_0 = arith.constant 0 : i32
    %c0_i32_1 = arith.constant 0 : i32
    return %c0_i32, %c0_i32_0 : i32, i32
  }
  func.func @transform_8(%arg0: i32) -> (i32, i32) {
    %c0_i32 = arith.constant 0 : i32
    %c0_i32_0 = arith.constant 0 : i32
    %c0_i32_1 = arith.constant 0 : i32
    return %c0_i32, %c0_i32_0 : i32, i32
  }
  func.func @transform_9(%arg0: i32) -> (i32, i32) {
    %c0_i32 = arith.constant 0 : i32
    %c0_i32_0 = arith.constant 0 : i32
    %c0_i32_1 = arith.constant 0 : i32
    return %c0_i32, %c0_i32_0 : i32, i32
  }
  func.func @transform_10(%arg0: i32) -> (i32, i32) {
    %c0_i32 = arith.constant 0 : i32
    %c0_i32_0 = arith.constant 0 : i32
    return %arg0, %c0_i32 : i32, i32
  }
  func.func @transform_11(%arg0: i32) -> (i32, i32) {
    %c0_i32 = arith.constant 0 : i32
    %c0_i32_0 = arith.constant 0 : i32
    return %arg0, %c0_i32 : i32, i32
  }
}

</mosaic_0001>

<bundles_post_ra>
// kernel: tpu_custom_call.1
= control target key start
LH: loop header
LB: loop body
LE: loop exit
PB: predicated region body
PF: predicated region fallthrough
CT: control target
= control target key end

     0   :  { %17 = vsyncpa [#allocation3], 0  ;;  %vm528_vm0 = vcmask 1046528   ;;  %vm431_vm1 = vcmask 56320   ;;  %vm168_vm2 = vcmask 261120   ;;  %s2521_s0 = inlined_call_operand.vmem [shape: bf16[16,16,32], index: 0, kind: input, shape index: {}]   ;;  %s2522_s1 = inlined_call_operand.vmem [shape: bf16[16,32], index: 1, kind: input, shape index: {}]   ;;  %s2523_s2 = inlined_call_operand.vmem [shape: f32[16,16,7], index: 2, kind: input, shape index: {}]   ;;  %s2524_s3 = inlined_call_operand.vmem [shape: f32[16,16], index: 3, kind: input, shape index: {}]   ;;  %s2525_s4 = inlined_call_operand.vmem [shape: s32[16,1], index: 4, kind: input, shape index: {}]   ;;  %s2526_s5 = inlined_call_operand.vmem [shape: bf16[32,32], index: 5, kind: input, shape index: {}]   ;;  %s2527_s6 = inlined_call_operand.vmem [shape: f32[1,32], index: 6, kind: input, shape index: {}]   ;;  %s2528_s7 = inlined_call_operand.vmem [shape: bf16[32,32], index: 7, kind: input, shape index: {}]   ;;  %s2529_s8 = inlined_call_operand.vmem [shape: f32[7,32], index: 8, kind: input, shape index: {}]   ;;  %s2530_s9 = inlined_call_operand.vmem [shape: f32[1,32], index: 9, kind: input, shape index: {}]   ;;  %s2531_s10 = inlined_call_operand.hbm [shape: f32[16,32], index: 10, kind: output, shape index: {0}]   ;;  %s2532_s11 = inlined_call_operand.hbm [shape: f32[16,16], index: 11, kind: output, shape index: {1}]  }
   0x1   :  { %v430_v0 = vld [vmem:[%s2529_s8] sm:$0x7f]  ;;  %v413_v1 = vld [vmem:[%s2523_s2 + $0x78] sm:$0xff]  ;;  %v1704_v2 = vld [vmem:[%s2526_s5 + $0x8] sm:$0xff] }
   0x2   :  { %1710 = vmatpush.msk.msra.mxu2 %vm528_vm0, %v430_v0  ;;  %v1707_v3 = vld [vmem:[%s2528_s7 + $0x8] sm:$0xff]  ;;  %223 = vmatpush.bf16.msra.mxu0 %v1704_v2  ;;  %v1703_v4 = vld [vmem:[%s2526_s5] sm:$0xff] }
   0x3   :  { %1670 = vmatmul.msk.f32.vlgmr.msra.gmra.mxu2 %vm431_vm1, %v413_v1  ;;  %1708 = vmatpush.bf16.msra.mxu3 %v1704_v2  ;;  %v1706_v5 = vld [vmem:[%s2528_s7] sm:$0xff]  ;;  %v1696_v7 = vld [vmem:[%s2521_s0 + $0x48] sm:$0xff] }
   0x4   :  { %374 = vmatpush.bf16.msra.mxu1 %v1707_v3  ;;  %v1687_v6 = vld [vmem:[%s2521_s0] sm:$0xff] }
   0x5   :  { %v1705_v8 = vld [vmem:[%s2522_s1] sm:$0xff] }
   0x6   :  { %224 = vmatpush.bf16.msra.mxu0 %v1703_v4 }
   0x7   :  { %18 = vsyncpa [#allocation5], 0  ;;  %1709 = vmatpush.bf16.msra.mxu3 %v1703_v4  ;;  %v414_v9 = vld [vmem:[%s2523_s2 + $0x80] sm:$0xff]  ;;  %v415_v10 = vld [vmem:[%s2523_s2 + $0x88] sm:$0xff]  ;;  %vm952_vm3 = vcmask 130112   ;;  %vm999_vm4 = vcmask 1041409  }
   0x8   :  { %375 = vmatpush.bf16.msra.mxu1 %v1706_v5  ;;  %v1688_v11 = vld [vmem:[%s2521_s0 + $0x8] sm:$0xff]  ;;  %v1697_v12 = vld [vmem:[%s2521_s0 + $0x50] sm:$0xff]  ;;  %v398_v13 = vld [vmem:[%s2523_s2] sm:$0xff]  ;;  %vm1001_vm5 = vcmask 1042434   ;;  %vm1003_vm6 = vcmask 1043459   ;;  %vm1005_vm7 = vcmask 1044484  }
   0x9   :  { %1625 = vmatmul.msk.bf16.vlgmr.msra.gmra.mxu0 %vm168_vm2, %v1687_v6  ;;  %v416_v14 = vld [vmem:[%s2523_s2 + $0x90] sm:$0xff]  ;;  %v399_v15 = vld [vmem:[%s2523_s2 + $0x8] sm:$0xff]  ;;  %v417_v16 = vld [vmem:[%s2523_s2 + $0x98] sm:$0xff]  ;;  %vm1007_vm8 = vcmask 1045509   ;;  %vm1009_vm9 = vcmask 1046534   ;;  %vm1011_vm10 = vcmask 1047559  }
   0xa   :  { %1634 = vmatmul.msk.bf16.vlgmr.msra.gmra.mxu3 %vm168_vm2, %v1696_v7  ;;  %v1689_v17 = vld [vmem:[%s2521_s0 + $0x10] sm:$0xff]  ;;  %v1698_v18 = vld [vmem:[%s2521_s0 + $0x58] sm:$0xff]  ;;  %v418_v20 = vld [vmem:[%s2523_s2 + $0xa0] sm:$0xff]  ;;  %vm1024_vm11 = vcmask 130048   ;;  %s1536_s21 = sshll.u32 %s2532_s11, 4  ;;  %s1867_s22 = smov 128   ;;  %s1537_s21 = int_to_ptr.hbm [resolvable:$true] %s1536_s21 }
   0xb   :  { %1653 = vmatmul.msk.bf16.vlgmr.msra.gmra.mxu1 %vm168_vm2, %v1705_v8  ;;  %1671 = vmatmul.msk.f32.gmra.mxu2 %vm431_vm1, %v414_v9  ;;  %v400_v19 = vld [vmem:[%s2523_s2 + $0x10] sm:$0xff]  ;;  %v401_v21 = vld [vmem:[%s2523_s2 + $0x18] sm:$0xff]  ;;  %v419_v22 = vld [vmem:[%s2523_s2 + $0xa8] sm:$0xff]  ;;  %s1868_s23 = smov 8  }
   0xc   :  { %1654 = vmatpush.msk.msrb.mxu1 %vm528_vm0, %v430_v0  ;;  %v1690_v23 = vld [vmem:[%s2521_s0 + $0x18] sm:$0xff]  ;;  %v1699_v24 = vld [vmem:[%s2521_s0 + $0x60] sm:$0xff]  ;;  %v420_v26 = vld [vmem:[%s2523_s2 + $0xb0] sm:$0xff] }
   0xd   :  { %v402_v25 = vld [vmem:[%s2523_s2 + $0x20] sm:$0xff]  ;;  %v403_v27 = vld [vmem:[%s2523_s2 + $0x28] sm:$0xff]  ;;  %v421_v28 = vld [vmem:[%s2523_s2 + $0xb8] sm:$0xff] }
   0xe   :  { %v1691_v29 = vld [vmem:[%s2521_s0 + $0x20] sm:$0xff]  ;;  %v1700_v30 = vld [vmem:[%s2521_s0 + $0x68] sm:$0xff]  ;;  %v404_v31 = vld [vmem:[%s2523_s2 + $0x30] sm:$0xff] }
   0xf   :  { %v422_v32 = vld [vmem:[%s2523_s2 + $0xc0] sm:$0xff]  ;;  %v405_v33 = vld [vmem:[%s2523_s2 + $0x38] sm:$0xff]  ;;  %v423_v34 = vld [vmem:[%s2523_s2 + $0xc8] sm:$0xff] }
  0x10   :  { %v1692_v35 = vld [vmem:[%s2521_s0 + $0x28] sm:$0xff]  ;;  %v1701_v36 = vld [vmem:[%s2521_s0 + $0x70] sm:$0xff]  ;;  %v406_v37 = vld [vmem:[%s2523_s2 + $0x40] sm:$0xff] }
  0x11   :  { %v424_v38 = vld [vmem:[%s2523_s2 + $0xd0] sm:$0xff]  ;;  %v407_v39 = vld [vmem:[%s2523_s2 + $0x48] sm:$0xff]  ;;  %v425_v40 = vld [vmem:[%s2523_s2 + $0xd8] sm:$0xff] }
  0x12   :  { %v1693_v41 = vld [vmem:[%s2521_s0 + $0x30] sm:$0xff]  ;;  %v1702_v42 = vld [vmem:[%s2521_s0 + $0x78] sm:$0xff]  ;;  %v426_v44 = vld [vmem:[%s2523_s2 + $0xe0] sm:$0xff] }
  0x13   :  { %1672 = vmatmul.msk.f32.gmra.mxu2 %vm431_vm1, %v415_v10  ;;  %v408_v43 = vld [vmem:[%s2523_s2 + $0x50] sm:$0xff]  ;;  %v409_v45 = vld [vmem:[%s2523_s2 + $0x58] sm:$0xff]  ;;  %v427_v46 = vld [vmem:[%s2523_s2 + $0xe8] sm:$0xff] }
  0x14   :  { %v1694_v47 = vld [vmem:[%s2521_s0 + $0x38] sm:$0xff]  ;;  %v410_v48 = vld [vmem:[%s2523_s2 + $0x60] sm:$0xff]  ;;  %v428_v49 = vld [vmem:[%s2523_s2 + $0xf0] sm:$0xff] }
  0x15   :  { %v411_v50 = vld [vmem:[%s2523_s2 + $0x68] sm:$0xff]  ;;  %v429_v51 = vld [vmem:[%s2523_s2 + $0xf8] sm:$0xff]  ;;  %v1695_v53 = vld [vmem:[%s2521_s0 + $0x40] sm:$0xff] }
  0x16   :  { %v412_v56 = vld [vmem:[%s2523_s2 + $0x70] sm:$0xff]  ;;  %v2150_v58 = vld [vmem:[%s2527_s6] ss:$0 sm:$0xff] }
  0x19   :  { %1626 = vmatmul.msk.bf16.gmra.mxu0 %vm168_vm2, %v1688_v11 }
  0x1a   :  { %1635 = vmatmul.msk.bf16.gmra.mxu3 %vm168_vm2, %v1697_v12  ;;  %v2166_v12 = vld [vmem:[%s2530_s9] ss:$0 sm:$0xff]  ;;  %s1523_s9 = sshll.u32 %s2531_s10, 4  ;;  %s1524_s9 = int_to_ptr.hbm [resolvable:$true] %s1523_s9 }
  0x1b   :  { %1655 = vmatmul.msk.f32.vlgmr.msrb.gmra.mxu1 %vm431_vm1, %v398_v13  ;;  %1673 = vmatmul.msk.f32.gmra.mxu2 %vm431_vm1, %v416_v14 }
  0x23   :  { %1656 = vmatmul.msk.f32.gmra.mxu1 %vm431_vm1, %v399_v15  ;;  %1674 = vmatmul.msk.f32.gmra.mxu2 %vm431_vm1, %v417_v16 }
  0x29   :  { %1627 = vmatmul.msk.bf16.gmra.mxu0 %vm168_vm2, %v1689_v17 }
  0x2a   :  { %1636 = vmatmul.msk.bf16.gmra.mxu3 %vm168_vm2, %v1698_v18 }
  0x2b   :  { %1657 = vmatmul.msk.f32.gmra.mxu1 %vm431_vm1, %v400_v19  ;;  %1675 = vmatmul.msk.f32.gmra.mxu2 %vm431_vm1, %v418_v20 }
  0x33   :  { %1658 = vmatmul.msk.f32.gmra.mxu1 %vm431_vm1, %v401_v21  ;;  %1676 = vmatmul.msk.f32.gmra.mxu2 %vm431_vm1, %v419_v22 }
  0x39   :  { %1628 = vmatmul.msk.bf16.gmra.mxu0 %vm168_vm2, %v1690_v23 }
  0x3a   :  { %1637 = vmatmul.msk.bf16.gmra.mxu3 %vm168_vm2, %v1699_v24 }
  0x3b   :  { %1659 = vmatmul.msk.f32.gmra.mxu1 %vm431_vm1, %v402_v25  ;;  %1677 = vmatmul.msk.f32.gmra.mxu2 %vm431_vm1, %v420_v26 }
  0x43   :  { %1660 = vmatmul.msk.f32.gmra.mxu1 %vm431_vm1, %v403_v27  ;;  %1678 = vmatmul.msk.f32.gmra.mxu2 %vm431_vm1, %v421_v28 }
  0x49   :  { %1629 = vmatmul.msk.bf16.gmra.mxu0 %vm168_vm2, %v1691_v29 }
  0x4a   :  { %1638 = vmatmul.msk.bf16.gmra.mxu3 %vm168_vm2, %v1700_v30 }
  0x4b   :  { %1661 = vmatmul.msk.f32.gmra.mxu1 %vm431_vm1, %v404_v31  ;;  %1679 = vmatmul.msk.f32.gmra.mxu2 %vm431_vm1, %v422_v32 }
  0x53   :  { %1662 = vmatmul.msk.f32.gmra.mxu1 %vm431_vm1, %v405_v33  ;;  %1680 = vmatmul.msk.f32.gmra.mxu2 %vm431_vm1, %v423_v34 }
  0x59   :  { %1630 = vmatmul.msk.bf16.gmra.mxu0 %vm168_vm2, %v1692_v35 }
  0x5a   :  { %1639 = vmatmul.msk.bf16.gmra.mxu3 %vm168_vm2, %v1701_v36 }
  0x5b   :  { %1663 = vmatmul.msk.f32.gmra.mxu1 %vm431_vm1, %v406_v37  ;;  %1681 = vmatmul.msk.f32.gmra.mxu2 %vm431_vm1, %v424_v38 }
  0x63   :  { %1664 = vmatmul.msk.f32.gmra.mxu1 %vm431_vm1, %v407_v39  ;;  %1682 = vmatmul.msk.f32.gmra.mxu2 %vm431_vm1, %v425_v40 }
  0x69   :  { %1631 = vmatmul.msk.bf16.gmra.mxu0 %vm168_vm2, %v1693_v41 }
  0x6a   :  { %1640 = vmatmul.msk.bf16.gmra.mxu3 %vm168_vm2, %v1702_v42 }
  0x6b   :  { %1665 = vmatmul.msk.f32.gmra.mxu1 %vm431_vm1, %v408_v43  ;;  %1683 = vmatmul.msk.f32.gmra.mxu2 %vm431_vm1, %v426_v44 }
  0x73   :  { %1666 = vmatmul.msk.f32.gmra.mxu1 %vm431_vm1, %v409_v45  ;;  %1684 = vmatmul.msk.f32.gmra.mxu2 %vm431_vm1, %v427_v46 }
  0x79   :  { %1632 = vmatmul.msk.bf16.gmra.mxu0 %vm168_vm2, %v1694_v47 }
  0x7b   :  { %1667 = vmatmul.msk.f32.gmra.mxu1 %vm431_vm1, %v410_v48  ;;  %1685 = vmatmul.msk.f32.gmra.mxu2 %vm431_vm1, %v428_v49 }
  0x83   :  { %1668 = vmatmul.msk.f32.gmra.mxu1 %vm431_vm1, %v411_v50  ;;  %1686 = vmatmul.msk.f32.gmra.mxu2 %vm431_vm1, %v429_v51 }
  0x86   :  { %v2135_v52 = vpop.f32.mrf.mxu2  ;;  %v226_v54 = vpop.f32.mrf.mxu0 }
  0x87   :  { %v310_v62 = vadd.f32 %v2150_v58, %v226_v54 }
  0x88   :  { %v2140_v55 = vpop.f32.mrf.mxu1 }
  0x89   :  { %1633 = vmatmul.msk.bf16.gmra.mxu0 %vm168_vm2, %v1695_v53  ;;  %v645_v63 = vperm.slane %v2140_v55, 0  ;;  %v384_v21 = vrot.slane %v2140_v55, 1  ;;  %v385_v53 = vrot.slane %v2140_v55, 2 }
  0x8b   :  { %1669 = vmatmul.msk.f32.gmra.mxu1 %vm431_vm1, %v412_v56  ;;  %v677_v4 = vadd.f32 %v645_v63, %v310_v62  ;;  %v646_v27 = vperm.slane %v384_v21, 0 }
  0x8d   :  { %v271_v57 = vpop.f32.mrf.mxu3 }
  0x8e   :  { %v2152_v59 = vpop.f32.mrf.mxu2  ;;  %v228_v60 = vpop.f32.mrf.mxu0  ;;  %v328_v7 = vadd.f32 %v2150_v58, %v271_v57 }
  0x8f   :  { %v311_v9 = vadd.f32 %v2150_v58, %v228_v60 }
  0x90   :  { %v2154_v61 = vpop.f32.mrf.mxu1 }
  0x91   :  { %v391_v1 = vrot.slane %v2154_v61, 1  ;;  %v678_v18 = vadd.f32 %v645_v63, %v311_v9  ;;  %v392_v34 = vrot.slane %v2154_v61, 2 }
  0x93   :  { %v654_v8 = vperm.slane %v391_v1, 0  ;;  %v655_v40 = vperm.slane %v392_v34, 0 }
  0x95   :  { %v273_v0 = vpop.f32.mrf.mxu3  ;;  %v695_v11 = vadd.f32 %v654_v8, %v328_v7 }
  0x96   :  { %v2159_v2 = vpop.f32.mrf.mxu2  ;;  %v231_v3 = vpop.f32.mrf.mxu0  ;;  %v329_v19 = vadd.f32 %v2150_v58, %v273_v0  ;;  %v647_v0 = vperm.slane %v385_v53, 0 }
  0x97   :  { %v312_v23 = vadd.f32 %v2150_v58, %v231_v3 }
  0x98   :  { %v549_v5 = vpop.f32.mrf.mxu1  ;;  %v696_v26 = vadd.f32 %v654_v8, %v329_v19 }
  0x99   :  { %v709_v6 = vadd.f32 %v677_v4, %v549_v5  ;;  %v679_v33 = vadd.f32 %v646_v27, %v312_v23 }
  0x9b   :  { %1737 = vtanh.f32 %v709_v6 }
  0x9d   :  { %v276_v10 = vpop.f32.mrf.mxu3 }
  0x9e   :  { %v603_v13 = vpop.f32.mrf.mxu2  ;;  %v233_v14 = vpop.f32.mrf.mxu0  ;;  %v330_v36 = vadd.f32 %v2150_v58, %v276_v10 }
  0x9f   :  { %v727_v15 = vadd.f32 %v695_v11, %v603_v13  ;;  %v313_v39 = vadd.f32 %v2150_v58, %v233_v14  ;;  %v393_v11 = vrot.slane %v2154_v61, 3 }
  0xa0   :  { %v552_v16 = vpop.f32.mrf.mxu1  ;;  %v697_v43 = vadd.f32 %v655_v40, %v330_v36 }
  0xa1   :  { %v1738_v17 = vpop.eup %1737  ;;  %1739 = vtanh.f32 %v727_v15  ;;  %v710_v22 = vadd.f32 %v678_v18, %v552_v16  ;;  %v680_v49 = vadd.f32 %v646_v27, %v313_v39 }
  0xa2   :  { %v777_v20 = vmul.f32 %v1738_v17, %v2166_v12 }
  0xa3   :  { %1741 = vtanh.f32 %v710_v22 }
  0xa4   :  { %v809_v24 = vsel %vm168_vm2, %v777_v20, 0.0  ;;  %v656_v20 = vperm.slane %v393_v11, 0 }
  0xa5   :  { %810 = vadd.xlane.f32.xlu0 %v809_v24  ;;  %v278_v25 = vpop.f32.mrf.mxu3 }
  0xa6   :  { %v606_v28 = vpop.f32.mrf.mxu2  ;;  %v236_v29 = vpop.f32.mrf.mxu0  ;;  %v331_v54 = vadd.f32 %v2150_v58, %v278_v25 }
  0xa7   :  { %v1740_v30 = vpop.eup %1739  ;;  %v728_v31 = vadd.f32 %v696_v26, %v606_v28  ;;  %v314_v57 = vadd.f32 %v2150_v58, %v236_v29 }
  0xa8   :  { %v555_v32 = vpop.f32.mrf.mxu1  ;;  %v795_v35 = vmul.f32 %v1740_v30, %v2166_v12  ;;  %v698_v3 = vadd.f32 %v655_v40, %v331_v54 }
  0xa9   :  { %1743 = vtanh.f32 %v728_v31  ;;  %v711_v37 = vadd.f32 %v679_v33, %v555_v32  ;;  %v1742_v41 = vpop.eup %1741  ;;  %v681_v6 = vadd.f32 %v647_v0, %v314_v57  ;;  %v386_v33 = vrot.slane %v2140_v55, 3 }
  0xaa   :  { %v863_v38 = vsel %vm168_vm2, %v795_v35, 0.0  ;;  %v778_v50 = vmul.f32 %v1742_v41, %v2166_v12 }
  0xab   :  { %1745 = vtanh.f32 %v711_v37  ;;  %v648_v40 = vperm.slane %v386_v33, 0 }
  0xac   :  { %v812_v63 = vsel %vm168_vm2, %v778_v50, 0.0 }
  0xad   :  { %864 = vadd.xlane.f32.xlu0 %v863_v38  ;;  %v281_v42 = vpop.f32.mrf.mxu3 }
  0xae   :  { %v609_v44 = vpop.f32.mrf.mxu2  ;;  %v238_v45 = vpop.f32.mrf.mxu0  ;;  %v332_v15 = vadd.f32 %v2150_v58, %v281_v42 }
  0xaf   :  { %v1744_v46 = vpop.eup %1743  ;;  %v729_v47 = vadd.f32 %v697_v43, %v609_v44  ;;  %v315_v16 = vadd.f32 %v2150_v58, %v238_v45 }
  0xb0   :  { %v558_v48 = vpop.f32.mrf.mxu1  ;;  %v796_v51 = vmul.f32 %v1744_v46, %v2166_v12  ;;  %v699_v22 = vadd.f32 %v656_v20, %v332_v15 }
  0xb1   :  { %1747 = vtanh.f32 %v729_v47  ;;  %v712_v56 = vadd.f32 %v680_v49, %v558_v48  ;;  %v1746_v62 = vpop.eup %1745  ;;  %v682_v25 = vadd.f32 %v647_v0, %v315_v16  ;;  %v394_v49 = vrot.slane %v2154_v61, 4 }
  0xb2   :  { %v866_v60 = vsel %vm168_vm2, %v796_v51, 0.0  ;;  %v779_v7 = vmul.f32 %v1746_v62, %v2166_v12 }
  0xb3   :  { %867 = vadd.xlane.f32.xlu1 %v866_v60  ;;  %1749 = vtanh.f32 %v712_v56 }
  0xb4   :  { %v815_v18 = vsel %vm168_vm2, %v779_v7, 0.0 }
  0xb5   :  { %813 = vadd.xlane.f32.xlu0 %v812_v63  ;;  %v283_v1 = vpop.f32.mrf.mxu3  ;;  %v657_v63 = vperm.slane %v394_v49, 0 }
  0xb6   :  { %v612_v4 = vpop.f32.mrf.mxu2  ;;  %v241_v5 = vpop.f32.mrf.mxu0  ;;  %v333_v34 = vadd.f32 %v2150_v58, %v283_v1 }
  0xb7   :  { %v1748_v8 = vpop.eup %1747  ;;  %v730_v9 = vadd.f32 %v698_v3, %v612_v4  ;;  %v316_v36 = vadd.f32 %v2150_v58, %v241_v5 }
  0xb8   :  { %v561_v10 = vpop.f32.mrf.mxu1  ;;  %v797_v14 = vmul.f32 %v1748_v8, %v2166_v12  ;;  %v700_v42 = vadd.f32 %v656_v20, %v333_v34 }
  0xb9   :  { %v713_v13 = vadd.f32 %v681_v6, %v561_v10  ;;  %1751 = vtanh.f32 %v730_v9  ;;  %v1750_v19 = vpop.eup %1749  ;;  %v683_v45 = vadd.f32 %v648_v40, %v316_v36 }
  0xba   :  { %v869_v17 = vsel %vm168_vm2, %v797_v14, 0.0  ;;  %v780_v26 = vmul.f32 %v1750_v19, %v2166_v12 }
  0xbb   :  { %1753 = vtanh.f32 %v713_v13  ;;  %870 = vadd.xlane.f32.xlu2 %v869_v17  ;;  %816 = vadd.xlane.f32.xlu1 %v815_v18  ;;  %v387_v13 = vrot.slane %v2140_v55, 4 }
  0xbc   :  { %v818_v38 = vsel %vm168_vm2, %v780_v26, 0.0 }
  0xbd   :  { %v286_v21 = vpop.f32.mrf.mxu3  ;;  %v649_v19 = vperm.slane %v387_v13, 0 }
  0xbe   :  { %v615_v23 = vpop.f32.mrf.mxu2  ;;  %v243_v24 = vpop.f32.mrf.mxu0  ;;  %v334_v54 = vadd.f32 %v2150_v58, %v286_v21 }
  0xbf   :  { %v1752_v27 = vpop.eup %1751  ;;  %v731_v28 = vadd.f32 %v699_v22, %v615_v23  ;;  %v317_v57 = vadd.f32 %v2150_v58, %v243_v24 }
  0xc0   :  { %v564_v29 = vpop.f32.mrf.mxu1  ;;  %v798_v32 = vmul.f32 %v1752_v27, %v2166_v12  ;;  %v701_v1 = vadd.f32 %v657_v63, %v334_v54 }
  0xc1   :  { %v1754_v30 = vpop.eup %1753  ;;  %v714_v31 = vadd.f32 %v682_v25, %v564_v29  ;;  %1755 = vtanh.f32 %v731_v28  ;;  %v684_v5 = vadd.f32 %v648_v40, %v317_v57  ;;  %v395_v28 = vrot.slane %v2154_v61, 5 }
  0xc2   :  { %v781_v35 = vmul.f32 %v1754_v30, %v2166_v12  ;;  %v872_v37 = vsel %vm168_vm2, %v798_v32, 0.0 }
  0xc3   :  { %1757 = vtanh.f32 %v714_v31  ;;  %873 = vadd.xlane.f32.xlu0 %v872_v37  ;;  %819 = vadd.xlane.f32.xlu1 %v818_v38  ;;  %v658_v37 = vperm.slane %v395_v28, 0 }
  0xc4   :  { %v821_v39 = vsel %vm168_vm2, %v781_v35, 0.0 }
  0xc5   :  { %822 = vadd.xlane.f32.xlu2 %v821_v39  ;;  %v288_v41 = vpop.f32.mrf.mxu3 }
  0xc6   :  { %v618_v43 = vpop.f32.mrf.mxu2  ;;  %v246_v44 = vpop.f32.mrf.mxu0  ;;  %v335_v14 = vadd.f32 %v2150_v58, %v288_v41 }
  0xc7   :  { %v1756_v46 = vpop.eup %1755  ;;  %v732_v47 = vadd.f32 %v700_v42, %v618_v43  ;;  %v318_v16 = vadd.f32 %v2150_v58, %v246_v44 }
  0xc8   :  { %v567_v48 = vpop.f32.mrf.mxu1  ;;  %v799_v53 = vmul.f32 %v1756_v46, %v2166_v12  ;;  %v702_v20 = vadd.f32 %v657_v63, %v335_v14 }
  0xc9   :  { %v1758_v50 = vpop.eup %1757  ;;  %v715_v51 = vadd.f32 %v683_v45, %v567_v48  ;;  %1759 = vtanh.f32 %v732_v47  ;;  %v685_v23 = vadd.f32 %v649_v19, %v318_v16  ;;  %v388_v48 = vrot.slane %v2140_v55, 5 }
  0xca   :  { %v782_v56 = vmul.f32 %v1758_v50, %v2166_v12  ;;  %v875_v60 = vsel %vm168_vm2, %v799_v53, 0.0 }
  0xcb   :  { %1761 = vtanh.f32 %v715_v51  ;;  %876 = vadd.xlane.f32.xlu1 %v875_v60  ;;  %v650_v57 = vperm.slane %v388_v48, 0 }
  0xcc   :  { %v824_v62 = vsel %vm168_vm2, %v782_v56, 0.0 }
  0xcd   :  { %825 = vadd.xlane.f32.xlu2 %v824_v62  ;;  %v291_v0 = vpop.f32.mrf.mxu3 }
  0xce   :  { %v621_v3 = vpop.f32.mrf.mxu2  ;;  %v248_v4 = vpop.f32.mrf.mxu0  ;;  %v336_v32 = vadd.f32 %v2150_v58, %v291_v0 }
  0xcf   :  { %v1760_v6 = vpop.eup %1759  ;;  %v733_v7 = vadd.f32 %v701_v1, %v621_v3  ;;  %v319_v34 = vadd.f32 %v2150_v58, %v248_v4 }
  0xd0   :  { %v570_v8 = vpop.f32.mrf.mxu1  ;;  %v800_v11 = vmul.f32 %v1760_v6, %v2166_v12  ;;  %v703_v38 = vadd.f32 %v658_v37, %v336_v32 }
  0xd1   :  { %v1762_v9 = vpop.eup %1761  ;;  %v716_v10 = vadd.f32 %v684_v5, %v570_v8  ;;  %1763 = vtanh.f32 %v733_v7  ;;  %v686_v41 = vadd.f32 %v649_v19, %v319_v34  ;;  %v396_v5 = vrot.slane %v2154_v61, 6 }
  0xd2   :  { %v783_v15 = vmul.f32 %v1762_v9, %v2166_v12  ;;  %v878_v17 = vsel %vm168_vm2, %v800_v11, 0.0 }
  0xd3   :  { %1765 = vtanh.f32 %v716_v10  ;;  %v659_v16 = vperm.slane %v396_v5, 0 }
  0xd4   :  { %v827_v18 = vsel %vm168_vm2, %v783_v15, 0.0 }
  0xd5   :  { %879 = vadd.xlane.f32.xlu2 %v878_v17  ;;  %828 = vadd.xlane.f32.xlu0 %v827_v18  ;;  %v293_v25 = vpop.f32.mrf.mxu3 }
  0xd6   :  { %v624_v21 = vpop.f32.mrf.mxu2  ;;  %v251_v22 = vpop.f32.mrf.mxu0  ;;  %v337_v49 = vadd.f32 %v2150_v58, %v293_v25 }
  0xd7   :  { %v1764_v24 = vpop.eup %1763  ;;  %v734_v26 = vadd.f32 %v702_v20, %v624_v21  ;;  %v320_v53 = vadd.f32 %v2150_v58, %v251_v22 }
  0xd8   :  { %v573_v27 = vpop.f32.mrf.mxu1  ;;  %v801_v31 = vmul.f32 %v1764_v24, %v2166_v12  ;;  %v704_v60 = vadd.f32 %v658_v37, %v337_v49 }
  0xd9   :  { %v1766_v29 = vpop.eup %1765  ;;  %v717_v30 = vadd.f32 %v685_v23, %v573_v27  ;;  %1767 = vtanh.f32 %v734_v26  ;;  %v687_v0 = vadd.f32 %v650_v57, %v320_v53  ;;  %v389_v27 = vrot.slane %v2140_v55, 6 }
  0xda   :  { %v784_v33 = vmul.f32 %v1766_v29, %v2166_v12  ;;  %v881_v35 = vsel %vm168_vm2, %v801_v31, 0.0  ;;  %v390_v53 = vrot.slane %v2140_v55, 7 }
  0xdb   :  { %1769 = vtanh.f32 %v717_v30 }
  0xdc   :  { %v830_v36 = vsel %vm168_vm2, %v784_v33, 0.0  ;;  %v651_v33 = vperm.slane %v389_v27, 0 }
  0xdd   :  { %882 = vadd.xlane.f32.xlu0 %v881_v35  ;;  %831 = vadd.xlane.f32.xlu1 %v830_v36  ;;  %v296_v50 = vpop.f32.mrf.mxu3 }
  0xde   :  { %v627_v39 = vpop.f32.mrf.mxu2  ;;  %v253_v40 = vpop.f32.mrf.mxu0  ;;  %v338_v9 = vadd.f32 %v2150_v58, %v296_v50 }
  0xdf   :  { %v1768_v42 = vpop.eup %1767  ;;  %v735_v43 = vadd.f32 %v703_v38, %v627_v39  ;;  %v321_v11 = vadd.f32 %v2150_v58, %v253_v40 }
  0xe0   :  { %v576_v44 = vpop.f32.mrf.mxu1  ;;  %v802_v47 = vmul.f32 %v1768_v42, %v2166_v12  ;;  %v705_v17 = vadd.f32 %v659_v16, %v338_v9  ;;  %v397_v42 = vrot.slane %v2154_v61, 7 }
  0xe1   :  { %v1770_v45 = vpop.eup %1769  ;;  %v718_v46 = vadd.f32 %v686_v41, %v576_v44  ;;  %1771 = vtanh.f32 %v735_v43  ;;  %v688_v20 = vadd.f32 %v650_v57, %v321_v11 }
  0xe2   :  { %v785_v51 = vmul.f32 %v1770_v45, %v2166_v12  ;;  %v884_v54 = vsel %vm168_vm2, %v802_v47, 0.0 }
  0xe3   :  { %1773 = vtanh.f32 %v718_v46 }
  0xe4   :  { %v833_v56 = vsel %vm168_vm2, %v785_v51, 0.0  ;;  %v660_v51 = vperm.slane %v397_v42, 0 }
  0xe5   :  { %885 = vadd.xlane.f32.xlu1 %v884_v54  ;;  %834 = vadd.xlane.f32.xlu2 %v833_v56  ;;  %v298_v14 = vpop.f32.mrf.mxu3 }
  0xe6   :  { %v630_v62 = vpop.f32.mrf.mxu2  ;;  %v256_v63 = vpop.f32.mrf.mxu0  ;;  %v339_v28 = vadd.f32 %v2150_v58, %v298_v14 }
  0xe7   :  { %v1772_v1 = vpop.eup %1771  ;;  %v736_v3 = vadd.f32 %v704_v60, %v630_v62  ;;  %v322_v30 = vadd.f32 %v2150_v58, %v256_v63 }
  0xe8   :  { %v579_v4 = vpop.f32.mrf.mxu1  ;;  %v803_v8 = vmul.f32 %v1772_v1, %v2166_v12  ;;  %v706_v35 = vadd.f32 %v659_v16, %v339_v28  ;;  %v652_v1 = vperm.slane %v390_v53, 0  ;;  %v908_v53 = vld [vmem:[%s2525_s4 + $0x8] sm:$0xff] }
  0xe9   :  { %v1774_v6 = vpop.eup %1773  ;;  %v719_v7 = vadd.f32 %v687_v0, %v579_v4  ;;  %1775 = vtanh.f32 %v736_v3  ;;  %v689_v38 = vadd.f32 %v651_v33, %v322_v30  ;;  %v1865_v30 = vmov 0  }
  0xea   :  { %v786_v10 = vmul.f32 %v1774_v6, %v2166_v12  ;;  %v887_v13 = vsel %vm168_vm2, %v803_v8, 0.0  ;;  %1717 = vset.pattern.permute.xlu0 %v1865_v30  ;;  %1716 = vset.pattern.permute.xlu2 %v1865_v30 }
  0xeb   :  { %1777 = vtanh.f32 %v719_v7 }
  0xec   :  { %v836_v15 = vsel %vm168_vm2, %v786_v10, 0.0 }
  0xed   :  { %888 = vadd.xlane.f32.xlu2 %v887_v13  ;;  %837 = vadd.xlane.f32.xlu0 %v836_v15  ;;  %v301_v34 = vpop.f32.mrf.mxu3 }
  0xee   :  { %v633_v18 = vpop.f32.mrf.mxu2  ;;  %v258_v19 = vpop.f32.mrf.mxu0  ;;  %v340_v46 = vadd.f32 %v2150_v58, %v301_v34 }
  0xef   :  { %v1776_v21 = vpop.eup %1775  ;;  %v737_v22 = vadd.f32 %v705_v17, %v633_v18  ;;  %v323_v48 = vadd.f32 %v2150_v58, %v258_v19  ;;  %v653_v19 = vperm.slane %v2154_v61, 0 }
  0xf0   :  { %v582_v23 = vpop.f32.mrf.mxu1  ;;  %v804_v26 = vmul.f32 %v1776_v21, %v2166_v12  ;;  %v707_v54 = vadd.f32 %v660_v51, %v340_v46 }
  0xf1   :  { %v1778_v24 = vpop.eup %1777  ;;  %v720_v25 = vadd.f32 %v688_v20, %v582_v23  ;;  %1779 = vtanh.f32 %v737_v22  ;;  %v690_v60 = vadd.f32 %v651_v33, %v323_v48 }
  0xf2   :  { %v787_v29 = vmul.f32 %v1778_v24, %v2166_v12  ;;  %v890_v31 = vsel %vm168_vm2, %v804_v26, 0.0 }
  0xf3   :  { %1781 = vtanh.f32 %v720_v25 }
  0xf4   :  { %v839_v32 = vsel %vm168_vm2, %v787_v29, 0.0 }
  0xf5   :  { %891 = vadd.xlane.f32.xlu0 %v890_v31  ;;  %840 = vadd.xlane.f32.xlu1 %v839_v32  ;;  %v303_v13 = vpop.f32.mrf.mxu3 }
  0xf6   :  { %v636_v36 = vpop.f32.mrf.mxu2  ;;  %v261_v37 = vpop.f32.mrf.mxu0  ;;  %v341_v17 = vadd.f32 %v2150_v58, %v303_v13 }
  0xf7   :  { %v1780_v39 = vpop.eup %1779  ;;  %v738_v40 = vadd.f32 %v706_v35, %v636_v36  ;;  %v324_v8 = vadd.f32 %v2150_v58, %v261_v37 }
  0xf8   :  { %v585_v41 = vpop.f32.mrf.mxu1  ;;  %v805_v45 = vmul.f32 %v1780_v39, %v2166_v12  ;;  %v708_v27 = vadd.f32 %v660_v51, %v341_v17 }
  0xf9   :  { %v1782_v43 = vpop.eup %1781  ;;  %v721_v44 = vadd.f32 %v689_v38, %v585_v41  ;;  %1783 = vtanh.f32 %v738_v40  ;;  %v691_v15 = vadd.f32 %v652_v1, %v324_v8 }
  0xfa   :  { %v788_v47 = vmul.f32 %v1782_v43, %v2166_v12  ;;  %v893_v49 = vsel %vm168_vm2, %v805_v45, 0.0 }
  0xfb   :  { %1785 = vtanh.f32 %v721_v44 }
  0xfc   :  { %v842_v50 = vsel %vm168_vm2, %v788_v47, 0.0 }
  0xfd   :  { %894 = vadd.xlane.f32.xlu1 %v893_v49  ;;  %843 = vadd.xlane.f32.xlu2 %v842_v50 }
  0xfe   :  { %v639_v56 = vpop.f32.mrf.mxu2  ;;  %v263_v57 = vpop.f32.mrf.mxu0 }
  0xff   :  { %v1784_v62 = vpop.eup %1783  ;;  %v739_v63 = vadd.f32 %v707_v54, %v639_v56  ;;  %v325_v0 = vadd.f32 %v2150_v58, %v263_v57 }
 0x100   :  { %v588_v3 = vpop.f32.mrf.mxu1  ;;  %v806_v6 = vmul.f32 %v1784_v62, %v2166_v12 }
 0x101   :  { %v1786_v4 = vpop.eup %1785  ;;  %v722_v5 = vadd.f32 %v690_v60, %v588_v3  ;;  %1787 = vtanh.f32 %v739_v63  ;;  %v692_v7 = vadd.f32 %v652_v1, %v325_v0  ;;  %v907_v63 = vld [vmem:[%s2525_s4] sm:$0xff] }
 0x102   :  { %v789_v55 = vmul.f32 %v1786_v4, %v2166_v12  ;;  %v896_v9 = vsel %vm168_vm2, %v806_v6, 0.0 }
 0x103   :  { %1789 = vtanh.f32 %v722_v5  ;;  %v724_v10 = vadd.f32 %v692_v7, %v2135_v52 }
 0x104   :  { %v845_v11 = vsel %vm168_vm2, %v789_v55, 0.0 }
 0x105   :  { %897 = vadd.xlane.f32.xlu2 %v896_v9  ;;  %846 = vadd.xlane.f32.xlu0 %v845_v11  ;;  %1791 = vtanh.f32 %v724_v10 }
 0x106   :  { %v266_v14 = vpop.f32.mrf.mxu0  ;;  %v642_v25 = vpop.f32.mrf.mxu2 }
 0x107   :  { %v1788_v16 = vpop.eup %1787  ;;  %v326_v18 = vadd.f32 %v2150_v58, %v266_v14  ;;  %v740_v31 = vadd.f32 %v708_v27, %v642_v25 }
 0x108   :  { %v591_v20 = vpop.f32.mrf.mxu1  ;;  %v807_v52 = vmul.f32 %v1788_v16, %v2166_v12 }
 0x109   :  { %v1790_v21 = vpop.eup %1789  ;;  %v723_v22 = vadd.f32 %v691_v15, %v591_v20  ;;  %v693_v23 = vadd.f32 %v653_v19, %v326_v18 }
 0x10a   :  { %v790_v24 = vmul.f32 %v1790_v21, %v2166_v12  ;;  %v899_v26 = vsel %vm168_vm2, %v807_v52, 0.0 }
 0x10b   :  { %1793 = vtanh.f32 %v723_v22  ;;  %v725_v28 = vadd.f32 %v693_v23, %v2152_v59  ;;  %v1792_v61 = vpop.eup %1791 }
 0x10c   :  { %v848_v29 = vsel %vm168_vm2, %v790_v24, 0.0  ;;  %v792_v34 = vmul.f32 %v1792_v61, %v2166_v12 }
 0x10d   :  { %900 = vadd.xlane.f32.xlu0 %v899_v26  ;;  %849 = vadd.xlane.f32.xlu1 %v848_v29  ;;  %1795 = vtanh.f32 %v725_v28 }
 0x10e   :  { %v268_v32 = vpop.f32.mrf.mxu0  ;;  %1797 = vtanh.f32 %v740_v31  ;;  %v854_v40 = vsel %vm168_vm2, %v792_v34, 0.0 }
 0x10f   :  { %v327_v33 = vadd.f32 %v2150_v58, %v268_v32 }
 0x111   :  { %v1794_v35 = vpop.eup %1793  ;;  %v694_v36 = vadd.f32 %v653_v19, %v327_v33 }
 0x112   :  { %v791_v59 = vmul.f32 %v1794_v35, %v2166_v12 }
 0x113   :  { %v1796_v37 = vpop.eup %1795  ;;  %v726_v38 = vadd.f32 %v694_v36, %v2159_v2  ;;  %v905_v2 = vlaneseq }
 0x114   :  { %v851_v39 = vsel %vm168_vm2, %v791_v59, 0.0  ;;  %v793_v41 = vmul.f32 %v1796_v37, %v2166_v12  ;;  %v1798_v42 = vpop.eup %1797 }
 0x115   :  { %852 = vadd.xlane.f32.xlu2 %v851_v39  ;;  %855 = vadd.xlane.f32.xlu0 %v854_v40  ;;  %1799 = vtanh.f32 %v726_v38  ;;  %v808_v44 = vmul.f32 %v1798_v42, %v2166_v12  ;;  %v2279_v49 = vand.u32 127, %v905_v2 }
 0x116   :  { %v857_v58 = vsel %vm168_vm2, %v793_v41, 0.0 }
 0x117   :  { %858 = vadd.xlane.f32.xlu1 %v857_v58  ;;  %v902_v47 = vsel %vm168_vm2, %v808_v44, 0.0  ;;  %v2282_v50 = vadd.s32 4294967288, %v2279_v49 }
 0x118   :  { %v811_v43 = vpop.xlane.xlu0 %810 }
 0x119   :  { %v949_v7 = vperm.slane %v811_v43, %v2279_v49 }
 0x11b   :  { %v1800_v45 = vpop.eup %1799 }
 0x11c   :  { %v794_v46 = vmul.f32 %v1800_v45, %v2166_v12 }
 0x11e   :  { %v860_v48 = vsel %vm168_vm2, %v794_v46, 0.0 }
 0x11f   :  { %903 = vadd.xlane.f32.xlu1 %v902_v47  ;;  %861 = vadd.xlane.f32.xlu2 %v860_v48 }
 0x120   :  { %v865_v51 = vpop.xlane.xlu0 %864 }
 0x121   :  { %v978_v54 = vperm.slane %v865_v51, %v2279_v49 }
 0x126   :  { %v868_v12 = vpop.xlane.xlu1 %867 }
 0x127   :  { %v979_v56 = vperm.slane %v868_v12, %v2282_v50 }
 0x128   :  { %v814_v3 = vpop.xlane.xlu0 %813 }
 0x129   :  { %913 = vperm.xlu0 %1717, %v908_v53   ;;  %v2290_v57 = vsel %vm952_vm3, %v979_v56, %v978_v54  ;;  %v951_v5 = vperm.slane %v814_v3, %v2282_v50 }
 0x12b   :  { %v953_v11 = vsel %vm952_vm3, %v951_v5, %v949_v7 }
 0x12e   :  { %v871_v60 = vpop.xlane.xlu2 %870  ;;  %v817_v62 = vpop.xlane.xlu1 %816 }
 0x12f   :  { %v954_v6 = vperm.slane %v817_v62, %v2279_v49  ;;  %v981_v37 = vperm.slane %v871_v60, %v2279_v49 }
 0x136   :  { %v820_v1 = vpop.xlane.xlu1 %819  ;;  %v874_v16 = vpop.xlane.xlu0 %873 }
 0x137   :  { %910 = vperm.xlu2 %1716, %v907_v63   ;;  %v955_v4 = vperm.slane %v820_v1, %v2282_v50  ;;  %v982_v34 = vperm.slane %v874_v16, %v2282_v50 }
 0x138   :  { %v823_v0 = vpop.xlane.xlu2 %822 }
 0x139   :  { %v956_v55 = vsel %vm952_vm3, %v955_v4, %v954_v6  ;;  %v957_v9 = vperm.slane %v823_v0, %v2279_v49  ;;  %v983_v40 = vsel %vm952_vm3, %v982_v34, %v981_v37 }
 0x13a   :  { %v1000_v13 = vsel %vm999_vm4, %v956_v55, %v953_v11 }
 0x13e   :  { %v877_v17 = vpop.xlane.xlu1 %876 }
 0x13f   :  { %v984_v38 = vperm.slane %v877_v17, %v2279_v49 }
 0x140   :  { %v826_v8 = vpop.xlane.xlu2 %825 }
 0x141   :  { %v958_v10 = vperm.slane %v826_v8, %v2282_v50 }
 0x143   :  { %v959_v14 = vsel %vm952_vm3, %v958_v10, %v957_v9 }
 0x144   :  { %v1002_v15 = vsel %vm1001_vm5, %v959_v14, %v1000_v13 }
 0x148   :  { %v829_v18 = vpop.xlane.xlu0 %828  ;;  %v880_v19 = vpop.xlane.xlu2 %879 }
 0x149   :  { %v985_v35 = vperm.slane %v880_v19, %v2282_v50  ;;  %v960_v36 = vperm.slane %v829_v18, %v2279_v49 }
 0x14b   :  { %v986_v41 = vsel %vm952_vm3, %v985_v35, %v984_v38 }
 0x150   :  { %v832_v20 = vpop.xlane.xlu1 %831  ;;  %v883_v21 = vpop.xlane.xlu0 %882 }
 0x151   :  { %v961_v33 = vperm.slane %v832_v20, %v2282_v50  ;;  %v987_v43 = vperm.slane %v883_v21, %v2279_v49 }
 0x153   :  { %v962_v39 = vsel %vm952_vm3, %v961_v33, %v960_v36 }
 0x154   :  { %v1004_v44 = vsel %vm1003_vm6, %v962_v39, %v1002_v15  ;;  %v1047_v39 = vld [vmem:[%s2524_s3] sm:$0xff] }
 0x158   :  { %v835_v22 = vpop.xlane.xlu2 %834  ;;  %v886_v52 = vpop.xlane.xlu1 %885 }
 0x159   :  { %v988_v45 = vperm.slane %v886_v52, %v2282_v50  ;;  %v963_v48 = vperm.slane %v835_v22, %v2279_v49 }
 0x15b   :  { %v989_v3 = vsel %vm952_vm3, %v988_v45, %v987_v43  ;;  %v1048_v45 = vld [vmem:[%s2524_s3 + $0x8] sm:$0xff]  ;;  %s1866_s3 = smov [#allocation4]  }
 0x15c   :  { %s1534_s18 = sshll.u32 %s1866_s3, 4  ;;  %s1535_s18 = int_to_ptr.vmem [resolvable:$true] %s1534_s18 }
 0x160   :  { %v838_v23 = vpop.xlane.xlu0 %837  ;;  %v889_v24 = vpop.xlane.xlu2 %888 }
 0x161   :  { %v964_v58 = vperm.slane %v838_v23, %v2282_v50  ;;  %v990_v4 = vperm.slane %v889_v24, %v2279_v49 }
 0x163   :  { %v965_v62 = vsel %vm952_vm3, %v964_v58, %v963_v48 }
 0x164   :  { %v1006_v10 = vsel %vm1005_vm7, %v965_v62, %v1004_v44 }
 0x168   :  { %v841_v25 = vpop.xlane.xlu1 %840  ;;  %v892_v26 = vpop.xlane.xlu0 %891 }
 0x169   :  { %v966_v54 = vperm.slane %v841_v25, %v2279_v49  ;;  %v991_v63 = vperm.slane %v892_v26, %v2282_v50 }
 0x16b   :  { %v992_v14 = vsel %vm952_vm3, %v991_v63, %v990_v4 }
 0x170   :  { %v844_v27 = vpop.xlane.xlu2 %843  ;;  %v895_v28 = vpop.xlane.xlu1 %894 }
 0x171   :  { %v967_v46 = vperm.slane %v844_v27, %v2282_v50  ;;  %v993_v15 = vperm.slane %v895_v28, %v2279_v49 }
 0x173   :  { %v968_v5 = vsel %vm952_vm3, %v967_v46, %v966_v54 }
 0x178   :  { %v847_v29 = vpop.xlane.xlu0 %846  ;;  %v898_v30 = vpop.xlane.xlu2 %897 }
 0x179   :  { %v969_v0 = vperm.slane %v847_v29, %v2279_v49  ;;  %v994_v7 = vperm.slane %v898_v30, %v2282_v50 }
 0x17b   :  { %v995_v21 = vsel %vm952_vm3, %v994_v7, %v993_v15 }
 0x180   :  { %v850_v61 = vpop.xlane.xlu1 %849  ;;  %v2306_v31 = vpop.xlane.xlu0 %900 }
 0x181   :  { %v970_v51 = vperm.slane %v850_v61, %v2282_v50  ;;  %v996_v52 = vperm.slane %v2306_v31, %v2279_v49 }
 0x183   :  { %v971_v55 = vsel %vm952_vm3, %v970_v51, %v969_v0 }
 0x188   :  { %v853_v32 = vpop.xlane.xlu2 %852  ;;  %v856_v42 = vpop.xlane.xlu0 %855 }
 0x189   :  { %v972_v56 = vperm.slane %v853_v32, %v2279_v49  ;;  %v973_v60 = vperm.slane %v856_v42, %v2282_v50 }
 0x18a   :  { %v859_v59 = vpop.xlane.xlu1 %858 }
 0x18b   :  { %v975_v53 = vperm.slane %v859_v59, %v2279_v49  ;;  %v974_v11 = vsel %vm952_vm3, %v973_v60, %v972_v56 }
 0x192   :  { %v862_v47 = vpop.xlane.xlu2 %861  ;;  %v904_v8 = vpop.xlane.xlu1 %903 }
 0x193   :  { %v976_v12 = vperm.slane %v862_v47, %v2282_v50  ;;  %v997_v17 = vperm.slane %v904_v8, %v2282_v50 }
 0x195   :  { %v977_v1 = vsel %vm952_vm3, %v976_v12, %v975_v53  ;;  %v998_v26 = vsel %vm952_vm3, %v997_v17, %v996_v52  ;;  %v2373_v53 = vshrl.u32 %v905_v2, 7 }
 0x196   :  { %v1013_v6 = vsel %vm999_vm4, %v2290_v57, %v977_v1  ;;  %v1008_v57 = vsel %vm1007_vm8, %v968_v5, %v1006_v10 }
 0x197   :  { %v1014_v9 = vsel %vm1001_vm5, %v983_v40, %v1013_v6  ;;  %v1010_v19 = vsel %vm1009_vm9, %v971_v55, %v1008_v57  ;;  %v2376_v12 = vadd.s32 8, %v2373_v53  ;;  %1718 = vset.pattern.permute.xlu0 %v2373_v53 }
 0x198   :  { %v1015_v13 = vsel %vm1003_vm6, %v986_v41, %v1014_v9  ;;  %v1012_v22 = vsel %vm1011_vm10, %v974_v11, %v1010_v19 }
 0x199   :  { %v1016_v16 = vsel %vm1005_vm7, %v989_v3, %v1015_v13  ;;  %1719 = vset.pattern.permute.xlu1 %v2376_v12  ;;  %1720 = vset.pattern.permute.xlu2 %v2376_v12 }
 0x19a   :  { %v911_v18 = vpop.permute.xlu2 %910  ;;  %v1017_v20 = vsel %vm1007_vm8, %v992_v14, %v1016_v16 }
 0x19b   :  { %vm915_vm12 = vcmp.ge.s32.totalorder %v2279_v49, %v911_v18  ;;  %v914_v23 = vpop.permute.xlu0 %913  ;;  %v1018_v25 = vsel %vm1009_vm9, %v995_v21, %v1017_v20 }
 0x19c   :  { %v1022_v24 = vsel %vm915_vm12, -1e+30, %v1012_v22  ;;  %vm916_vm13 = vcmp.ge.s32.totalorder %v2279_v49, %v914_v23  ;;  %v1019_v27 = vsel %vm1011_vm10, %v998_v26, %v1018_v25  ;;  %v43_v25 = vld [vmem:[%s2521_s0 + $0xc] sm:$0xff]  }
 0x19d   :  { %v1025_v50 = vsel %vm1024_vm11, %v1022_v24, -inf  ;;  %v1023_v28 = vsel %vm916_vm13, -1e+30, %v1019_v27  ;;  %v45_v27 = vld [vmem:[%s2521_s0 + $0x14] sm:$0xff]  }
 0x19e   :  { %1026 = vmax.xlane.f32.xlu1 %v1025_v50  ;;  %v1028_v29 = vsel %vm1024_vm11, %v1023_v28, -inf  ;;  %v40_v50 = vld [vmem:[%s2521_s0] sm:$0xff]  }
 0x1a6   :  { %1029 = vmax.xlane.f32.xlu1 %v1028_v29  ;;  %v1070_v29 = vunpack.c.l.bf16 %v43_v25 }
 0x211   :  { %v1027_v30 = vpop.xlane.xlu1 %1026 }
 0x212   :  { %v1031_v61 = vsub.f32 %v1022_v24, %v1027_v30  ;;  %v42_v24 = vld [vmem:[%s2521_s0 + $0x8] sm:$0xf] }
 0x213   :  { %v1069_v26 = vunpack.c.l.bf16 %v42_v24 }
 0x214   :  { %v1033_v31 = vmul.f32 1.442695, %v1031_v61  ;;  %v1071_v61 = vunpack.c.h.bf16 %v43_v25 }
 0x216   :  { %1801 = vpow2.f32 %v1033_v31  ;;  %v47_v31 = vld [vmem:[%s2521_s0 + $0x1c] sm:$0xff]  }
 0x219   :  { %v1030_v32 = vpop.xlane.xlu1 %1029 }
 0x21a   :  { %v1032_v33 = vsub.f32 %v1023_v28, %v1030_v32  ;;  %v1067_v32 = vunpack.c.l.bf16 %v40_v50 }
 0x21c   :  { %v1802_v34 = vpop.eup %1801  ;;  %v1035_v35 = vmul.f32 1.442695, %v1032_v33  ;;  %v1068_v33 = vunpack.c.h.bf16 %v40_v50 }
 0x21d   :  { %v1037_v36 = vsel %vm1024_vm11, %v1802_v34, 0.0 }
 0x21e   :  { %1803 = vpow2.f32 %v1035_v35  ;;  %1038 = vadd.xlane.f32.xlu1 %v1037_v36  ;;  %v49_v35 = vld [vmem:[%s2521_s0 + $0x24] sm:$0xf]  ;;  %v1072_v36 = vunpack.c.l.bf16 %v45_v27 }
 0x224   :  { %v1804_v59 = vpop.eup %1803 }
 0x225   :  { %v1040_v49 = vsel %vm1024_vm11, %v1804_v59, 0.0 }
 0x226   :  { %1041 = vadd.xlane.f32.xlu2 %v1040_v49  ;;  %v1074_v49 = vunpack.c.l.bf16 %v47_v31 }
 0x291   :  { %v1039_v37 = vpop.xlane.xlu1 %1038 }
 0x292   :  { %1805 = vrcp.f32 %v1039_v37 }
 0x298   :  { %v1806_v38 = vpop.eup %1805 }
 0x299   :  { %v1042_v40 = vpop.xlane.xlu2 %1041  ;;  %v1045_v41 = vmul.f32 %v1806_v38, %v1802_v34  ;;  %v1073_v34 = vunpack.c.h.bf16 %v45_v27 }
 0x29a   :  { %1807 = vrcp.f32 %v1042_v40  ;;  %v1075_v40 = vunpack.c.h.bf16 %v47_v31 }
 0x29b   :  { %v1049_v58 = vmul.f32 %v1047_v39, %v1045_v41  ;;  %v1076_v39 = vunpack.c.l.bf16 %v49_v35 }
 0x29d   :  { %v1051_v42 = vmax.f32 %v1049_v58, 1e-06 }
 0x29f   :  { %v1053_v43 = vsel %vm1024_vm11, %v1051_v42, 0.0 }
 0x2a0   :  { %v1808_v44 = vpop.eup %1807  ;;  %1054 = vadd.xlane.f32.xlu1 %v1053_v43 }
 0x2a1   :  { %v1046_v46 = vmul.f32 %v1808_v44, %v1804_v59  ;;  %v53_v44 = vld [vmem:[%s2521_s0 + $0x34] sm:$0xff]  }
 0x2a2   :  { %v1081_v27 = vunpack.c.h.bf16 %v53_v44 }
 0x2a3   :  { %v1050_v47 = vmul.f32 %v1048_v45, %v1046_v46 }
 0x2a5   :  { %v1052_v48 = vmax.f32 %v1050_v47, 1e-06 }
 0x2a7   :  { %v1056_v51 = vsel %vm1024_vm11, %v1052_v48, 0.0 }
 0x2a8   :  { %1057 = vadd.xlane.f32.xlu1 %v1056_v51 }
 0x313   :  { %v1055_v54 = vpop.xlane.xlu1 %1054 }
 0x314   :  { %v1059_v56 = vmax.f32 %v1055_v54, 1e-12 }
 0x316   :  { %1809 = vrcp.f32 %v1059_v56 }
 0x31b   :  { %v1058_v60 = vpop.xlane.xlu1 %1057 }
 0x31c   :  { %v1810_v62 = vpop.eup %1809  ;;  %v1060_v63 = vmax.f32 %v1058_v60, 1e-12  ;;  %v52_v60 = vld [vmem:[%s2521_s0 + $0x30] sm:$0xf] }
 0x31d   :  { %v1063_v0 = vmul.f32 %v1810_v62, %v1051_v42 }
 0x31e   :  { %1811 = vrcp.f32 %v1060_v63 }
 0x31f   :  { %1065 = vst.msk [vmem:[#allocation4] sm:$0xff] %vm1024_vm11, %v1063_v0  ;;  %v1112_v2 = vperm.slane %v1063_v0, 1  ;;  %v1099_v1 = vperm.slane %v1063_v0, 0  ;;  %v1125_v5 = vperm.slane %v1063_v0, 2  ;;  %v1164_v6 = vperm.slane %v1063_v0, 5 }
 0x320   :  { %v1138_v7 = vperm.slane %v1063_v0, 3  ;;  %v1151_v55 = vperm.slane %v1063_v0, 4  ;;  %v1177_v8 = vperm.slane %v1063_v0, 6  ;;  %v1190_v9 = vperm.slane %v1063_v0, 7 }
 0x321   :  { %1123 = vperm.xlu2 %1720, %v1112_v2   ;;  %1110 = vperm.xlu1 %1719, %v1099_v1   ;;  %v1080_v0 = vunpack.c.l.bf16 %v53_v44 }
 0x322   :  { %1104 = vperm.xlu0 %1718, %v1099_v1  }
 0x324   :  { %v1812_v3 = vpop.eup %1811 }
 0x325   :  { %v1064_v4 = vmul.f32 %v1812_v3, %v1052_v48 }
 0x327   :  { %1066 = vst.msk [vmem:[#allocation4 + $0x8] sm:$0xff] %vm1024_vm11, %v1064_v4  ;;  %v1216_v10 = vperm.slane %v1064_v4, 1  ;;  %v1229_v11 = vperm.slane %v1064_v4, 2  ;;  %v1203_v13 = vperm.slane %v1064_v4, 0  ;;  %v1242_v14 = vperm.slane %v1064_v4, 3 }
 0x328   :  { %v1255_v15 = vperm.slane %v1064_v4, 4  ;;  %v1268_v57 = vperm.slane %v1064_v4, 5  ;;  %v1281_v16 = vperm.slane %v1064_v4, 6  ;;  %v1294_v17 = vperm.slane %v1064_v4, 7  ;;  %1542 = dma.vmem_to_hbm [thread:$0]  %s1535_s18, 256, %s1537_s21, [#allocation5], %s1867_s22, %s1867_s22, %s1868_s23  }
 0x329   :  { %1721 = vset.pattern.permute.xlu2 %v2373_v53  ;;  %1136 = vperm.xlu1 %1719, %v1125_v5  }
 0x32a   :  { %1117 = vperm.xlu0 %1718, %v1112_v2  }
 0x331   :  { %1169 = vperm.xlu2 %1721, %v1164_v6   ;;  %1149 = vperm.xlu1 %1719, %v1138_v7  }
 0x332   :  { %1130 = vperm.xlu0 %1718, %v1125_v5  }
 0x339   :  { %1724 = vset.pattern.permute.xlu2 %v2376_v12  ;;  %1162 = vperm.xlu1 %1719, %v1151_v55  }
 0x33a   :  { %1143 = vperm.xlu0 %1718, %v1138_v7   ;;  %v1079_v7 = vunpack.c.l.bf16 %v52_v60 }
 0x341   :  { %1188 = vperm.xlu2 %1724, %v1177_v8   ;;  %1723 = vset.pattern.permute.xlu1 %v2373_v53 }
 0x342   :  { %1156 = vperm.xlu0 %1718, %v1151_v55  }
 0x349   :  { %1201 = vperm.xlu2 %1724, %v1190_v9   ;;  %1182 = vperm.xlu1 %1723, %v1177_v8  }
 0x34a   :  { %1722 = vset.pattern.permute.xlu0 %v2376_v12 }
 0x351   :  { %1727 = vset.pattern.permute.xlu2 %v2373_v53  ;;  %1195 = vperm.xlu1 %1723, %v1190_v9  }
 0x352   :  { %1175 = vperm.xlu0 %1722, %v1164_v6  }
 0x359   :  { %1726 = vset.pattern.permute.xlu1 %v2376_v12  ;;  %1221 = vperm.xlu2 %1727, %v1216_v10  }
 0x35a   :  { %1725 = vset.pattern.permute.xlu0 %v2373_v53 }
 0x361   :  { %1234 = vperm.xlu2 %1727, %v1229_v11   ;;  %1214 = vperm.xlu1 %1726, %v1203_v13  }
 0x362   :  { %1208 = vperm.xlu0 %1725, %v1203_v13  }
 0x369   :  { %1730 = vset.pattern.permute.xlu2 %v2376_v12  ;;  %1227 = vperm.xlu1 %1726, %v1216_v10  }
 0x36a   :  { %1728 = vset.pattern.permute.xlu0 %v2376_v12 }
 0x371   :  { %1253 = vperm.xlu2 %1730, %v1242_v14   ;;  %1729 = vset.pattern.permute.xlu1 %v2373_v53 }
 0x372   :  { %1240 = vperm.xlu0 %1728, %v1229_v11  }
 0x379   :  { %1266 = vperm.xlu2 %1730, %v1255_v15   ;;  %1247 = vperm.xlu1 %1729, %v1242_v14   ;;  %v2442_v14 = vld [vmem:[%s2521_s0 + $0x3c] sm:$0xff]  }
 0x37a   :  { %1731 = vset.pattern.permute.xlu0 %v2373_v53 }
 0x37b   :  { %v1124_v52 = vpop.permute.xlu2 %1123 }
 0x37c   :  { %v1310_v37 = vmul.f32 %v1124_v52, %v1070_v29 }
 0x37e   :  { %v1349_v51 = vsel %vm168_vm2, %v1310_v37, 0.0 }
 0x381   :  { %1733 = vset.pattern.permute.xlu2 %v2373_v53  ;;  %1260 = vperm.xlu1 %1729, %v1255_v15  }
 0x382   :  { %1273 = vperm.xlu0 %1731, %v1268_v57  }
 0x389   :  { %1286 = vperm.xlu2 %1733, %v1281_v16   ;;  %1732 = vset.pattern.permute.xlu1 %v2376_v12 }
 0x38a   :  { %1734 = vset.pattern.permute.xlu0 %v2376_v12 }
 0x38b   :  { %v2415_v30 = vpop.permute.xlu2 %1169 }
 0x391   :  { %1299 = vperm.xlu2 %1733, %v1294_v17   ;;  %1279 = vperm.xlu1 %1732, %v1268_v57   ;;  %v50_v57 = vld [vmem:[%s2521_s0 + $0x28] sm:$0xff]  }
 0x392   :  { %1305 = vperm.xlu0 %1734, %v1294_v17  }
 0x393   :  { %v1111_v19 = vpop.permute.xlu1 %1110 }
 0x394   :  { %v1105_v18 = vpop.permute.xlu0 %1104  ;;  %v1308_v58 = vmul.f32 %v1111_v19, %v1068_v33 }
 0x395   :  { %v1307_v41 = vmul.f32 %v1105_v18, %v1067_v32 }
 0x396   :  { %v1340_v63 = vsel %vm168_vm2, %v1308_v58, 0.0 }
 0x397   :  { %v1339_v62 = vsel %vm168_vm2, %v1307_v41, 0.0 }
 0x398   :  { %v1341_v55 = vadd.f32 %v1340_v63, %v1339_v62 }
 0x399   :  { %1292 = vperm.xlu1 %1732, %v1281_v16  }
 0x39a   :  { %v1342_v18 = vrot.slane %v1341_v55, 4 }
 0x39b   :  { %v1137_v21 = vpop.permute.xlu1 %1136  ;;  %v1189_v53 = vpop.permute.xlu2 %1188 }
 0x39c   :  { %v1118_v20 = vpop.permute.xlu0 %1117  ;;  %v1312_v45 = vmul.f32 %v1137_v21, %v1072_v36  ;;  %v1320_v10 = vmul.f32 %v1189_v53, %v1080_v0  ;;  %v1082_v21 = vunpack.c.l.bf16 %v2442_v14 }
 0x39d   :  { %v1309_v59 = vmul.f32 %v1118_v20, %v1069_v26 }
 0x39e   :  { %v1358_v3 = vsel %vm168_vm2, %v1312_v45, 0.0  ;;  %v1394_v20 = vsel %vm168_vm2, %v1320_v10, 0.0 }
 0x39f   :  { %v1348_v46 = vsel %vm168_vm2, %v1309_v59, 0.0 }
 0x3a0   :  { %v1350_v1 = vadd.f32 %v1349_v51, %v1348_v46 }
 0x3a2   :  { %v1351_v13 = vrot.slane %v1350_v1, 4 }
 0x3a3   :  { %v1150_v23 = vpop.permute.xlu1 %1149  ;;  %v1202_v25 = vpop.permute.xlu2 %1201 }
 0x3a4   :  { %v1131_v22 = vpop.permute.xlu0 %1130  ;;  %v1314_v47 = vmul.f32 %v1150_v23, %v1074_v49  ;;  %v1077_v23 = vunpack.c.l.bf16 %v50_v57  ;;  %v1352_v24 = vadd.f32 %v1351_v13, %v1350_v1  ;;  %v1322_v31 = vmul.f32 %v1202_v25, %v1082_v21 }
 0x3a5   :  { %v1311_v38 = vmul.f32 %v1131_v22, %v1071_v61  ;;  %v1078_v61 = vunpack.c.h.bf16 %v50_v57 }
 0x3a6   :  { %v1367_v6 = vsel %vm168_vm2, %v1314_v47, 0.0  ;;  %v1353_v35 = vrot.slane %v1352_v24, 2  ;;  %v1403_v41 = vsel %vm168_vm2, %v1322_v31, 0.0 }
 0x3a7   :  { %v1357_v12 = vsel %vm168_vm2, %v1311_v38, 0.0 }
 0x3a8   :  { %v1359_v5 = vadd.f32 %v1358_v3, %v1357_v12  ;;  %v1354_v45 = vadd.f32 %v1353_v35, %v1352_v24  ;;  %v57_v35 = vld [vmem:[%s2521_s0 + $0x44] sm:$0xf] }
 0x3aa   :  { %v1360_v16 = vrot.slane %v1359_v5, 4  ;;  %v1355_v62 = vrot.slane %v1354_v45, 1 }
 0x3ab   :  { %v1163_v43 = vpop.permute.xlu1 %1162 }
 0x3ac   :  { %v1144_v28 = vpop.permute.xlu0 %1143  ;;  %v1316_v54 = vmul.f32 %v1163_v43, %v1076_v39  ;;  %v1361_v26 = vadd.f32 %v1360_v16, %v1359_v5 }
 0x3ad   :  { %v1313_v42 = vmul.f32 %v1144_v28, %v1073_v34  ;;  %v1343_v28 = vadd.f32 %v1342_v18, %v1341_v55  ;;  %v1317_v34 = vmul.f32 %v2415_v30, %v1077_v23  ;;  %v1356_v55 = vadd.f32 %v1355_v62, %v1354_v45 }
 0x3ae   :  { %v1376_v9 = vsel %vm168_vm2, %v1316_v54, 0.0  ;;  %v1362_v59 = vrot.slane %v1361_v26, 2 }
 0x3af   :  { %v1366_v2 = vsel %vm168_vm2, %v1313_v42, 0.0  ;;  %v1344_v38 = vrot.slane %v1343_v28, 2  ;;  %v1384_v44 = vsel %vm168_vm2, %v1317_v34, 0.0  ;;  %v58_v34 = vld [vmem:[%s2521_s0 + $0x48] sm:$0xff]  }
 0x3b0   :  { %v1368_v8 = vadd.f32 %v1367_v6, %v1366_v2  ;;  %v1363_v47 = vadd.f32 %v1362_v59, %v1361_v26  ;;  %v60_v59 = vld [vmem:[%s2521_s0 + $0x50] sm:$0xff]  }
 0x3b1   :  { %v1345_v51 = vadd.f32 %v1344_v38, %v1343_v28  ;;  %v1088_v38 = vunpack.c.h.bf16 %v60_v59 }
 0x3b2   :  { %v1369_v19 = vrot.slane %v1368_v8, 4  ;;  %v1364_v0 = vrot.slane %v1363_v47, 1 }
 0x3b3   :  { %v1346_v1 = vrot.slane %v1345_v51, 1  ;;  %v1222_v57 = vpop.permute.xlu2 %1221 }
 0x3b4   :  { %v1157_v48 = vpop.permute.xlu0 %1156  ;;  %v1370_v29 = vadd.f32 %v1369_v19, %v1368_v8 }
 0x3b5   :  { %v1315_v56 = vmul.f32 %v1157_v48, %v1075_v40 }
 0x3b6   :  { %v1371_v39 = vrot.slane %v1370_v29, 2 }
 0x3b7   :  { %v1375_v4 = vsel %vm168_vm2, %v1315_v56, 0.0 }
 0x3b8   :  { %v1377_v11 = vadd.f32 %v1376_v9, %v1375_v4  ;;  %v1372_v53 = vadd.f32 %v1371_v39, %v1370_v29  ;;  %v1365_v9 = vadd.f32 %v1364_v0, %v1363_v47  ;;  %v1085_v39 = vunpack.c.l.bf16 %v58_v34 }
 0x3ba   :  { %v1378_v22 = vrot.slane %v1377_v11, 4  ;;  %v1373_v3 = vrot.slane %v1372_v53, 1 }
 0x3bb   :  { %v1183_v15 = vpop.permute.xlu1 %1182  ;;  %v1235_v28 = vpop.permute.xlu2 %1234 }
 0x3bc   :  { %v1319_v17 = vmul.f32 %v1183_v15, %v1079_v7  ;;  %v1379_v32 = vadd.f32 %v1378_v22, %v1377_v11  ;;  %v1347_v11 = vadd.f32 %v1346_v1, %v1345_v51  ;;  %v1374_v13 = vadd.f32 %v1373_v3, %v1372_v53 }
 0x3be   :  { %v1393_v52 = vsel %vm168_vm2, %v1319_v17, 0.0  ;;  %v1380_v58 = vrot.slane %v1379_v32, 2  ;;  %v1499_v18 = vsel %vm999_vm4, %v1356_v55, %v1347_v11 }
 0x3bf   :  { %v1395_v50 = vadd.f32 %v1394_v20, %v1393_v52  ;;  %v1500_v20 = vsel %vm1001_vm5, %v1365_v9, %v1499_v18 }
 0x3c0   :  { %v1381_v54 = vadd.f32 %v1380_v58, %v1379_v32  ;;  %v1501_v22 = vsel %vm1003_vm6, %v1374_v13, %v1500_v20  ;;  %v1084_v58 = vunpack.c.l.bf16 %v57_v35 }
 0x3c1   :  { %v1396_v33 = vrot.slane %v1395_v50, 4 }
 0x3c2   :  { %v1382_v5 = vrot.slane %v1381_v54, 1 }
 0x3c3   :  { %v1196_v36 = vpop.permute.xlu1 %1195  ;;  %v1397_v42 = vadd.f32 %v1396_v33, %v1395_v50 }
 0x3c4   :  { %v1176_v49 = vpop.permute.xlu0 %1175  ;;  %v1321_v37 = vmul.f32 %v1196_v36, %v1081_v27  ;;  %v1383_v15 = vadd.f32 %v1382_v5, %v1381_v54  ;;  %v62_v36 = vld [vmem:[%s2521_s0 + $0x58] sm:$0xf] }
 0x3c5   :  { %v1318_v40 = vmul.f32 %v1176_v49, %v1078_v61  ;;  %v1398_v56 = vrot.slane %v1397_v42, 2  ;;  %v1086_v49 = vunpack.c.h.bf16 %v58_v34 }
 0x3c6   :  { %v1402_v43 = vsel %vm168_vm2, %v1321_v37, 0.0  ;;  %v1502_v52 = vsel %vm1005_vm7, %v1383_v15, %v1501_v22  ;;  %v63_v37 = vld [vmem:[%s2521_s0 + $0x5c] sm:$0xff]   ;;  %v67_v15 = vld [vmem:[%s2521_s0 + $0x6c] sm:$0xf] }
 0x3c7   :  { %v1385_v46 = vsel %vm168_vm2, %v1318_v40, 0.0  ;;  %v1404_v30 = vadd.f32 %v1403_v41, %v1402_v43  ;;  %v1399_v6 = vadd.f32 %v1398_v56, %v1397_v42  ;;  %v65_v40 = vld [vmem:[%s2521_s0 + $0x64] sm:$0xff]   ;;  %v1083_v41 = vunpack.c.h.bf16 %v2442_v14 }
 0x3c8   :  { %v1386_v48 = vadd.f32 %v1385_v46, %v1384_v44  ;;  %v1089_v43 = vunpack.c.l.bf16 %v62_v36  ;;  %v1087_v44 = vunpack.c.l.bf16 %v60_v59  ;;  %v1091_v45 = vunpack.c.h.bf16 %v63_v37 }
 0x3c9   :  { %v1405_v12 = vrot.slane %v1404_v30, 4  ;;  %v1400_v16 = vrot.slane %v1399_v6, 1  ;;  %v1090_v46 = vunpack.c.l.bf16 %v63_v37  ;;  %v1093_v18 = vunpack.c.h.bf16 %v65_v40 }
 0x3ca   :  { %v1387_v60 = vrot.slane %v1386_v48, 4  ;;  %v1327_v62 = vmul.f32 %v1235_v28, %v1087_v44 }
 0x3cb   :  { %v1406_v63 = vadd.f32 %v1405_v12, %v1404_v30  ;;  %v1401_v23 = vadd.f32 %v1400_v16, %v1399_v6  ;;  %v1254_v61 = vpop.permute.xlu2 %1253  ;;  %v1325_v12 = vmul.f32 %v1222_v57, %v1085_v39 }
 0x3cc   :  { %v1388_v2 = vadd.f32 %v1387_v60, %v1386_v48  ;;  %v1092_v48 = vunpack.c.l.bf16 %v65_v40  ;;  %v1330_v0 = vmul.f32 %v1254_v61, %v1090_v46 }
 0x3cd   :  { %v1407_v4 = vrot.slane %v1406_v63, 2  ;;  %v1420_v3 = vsel %vm168_vm2, %v1325_v12, 0.0 }
 0x3ce   :  { %v1389_v7 = vrot.slane %v1388_v2, 2  ;;  %v1439_v11 = vsel %vm168_vm2, %v1330_v0, 0.0 }
 0x3cf   :  { %v1408_v8 = vadd.f32 %v1407_v4, %v1406_v63 }
 0x3d0   :  { %v1390_v10 = vadd.f32 %v1389_v7, %v1388_v2  ;;  %v1429_v7 = vsel %vm168_vm2, %v1327_v62, 0.0 }
 0x3d1   :  { %v1409_v19 = vrot.slane %v1408_v8, 1 }
 0x3d2   :  { %v1391_v17 = vrot.slane %v1390_v10, 1 }
 0x3d3   :  { %v1410_v24 = vadd.f32 %v1409_v19, %v1408_v8  ;;  %v1215_v26 = vpop.permute.xlu1 %1214  ;;  %v1267_v33 = vpop.permute.xlu2 %1266  ;;  %v70_v8 = vld [vmem:[%s2521_s0 + $0x78] sm:$0xff]  }
 0x3d4   :  { %v1392_v21 = vadd.f32 %v1391_v17, %v1390_v10  ;;  %v1209_v31 = vpop.permute.xlu0 %1208  ;;  %v1324_v56 = vmul.f32 %v1215_v26, %v1084_v58  ;;  %v1332_v2 = vmul.f32 %v1267_v33, %v1092_v48  ;;  %v1097_v19 = vunpack.c.l.bf16 %v70_v8 }
 0x3d5   :  { %v1323_v54 = vmul.f32 %v1209_v31, %v1083_v41 }
 0x3d6   :  { %v1503_v25 = vsel %vm1007_vm8, %v1392_v21, %v1502_v52  ;;  %v1412_v5 = vsel %vm168_vm2, %v1324_v56, 0.0  ;;  %v1448_v57 = vsel %vm168_vm2, %v1332_v2, 0.0  ;;  %v1094_v52 = vunpack.c.l.bf16 %v67_v15 }
 0x3d7   :  { %v1504_v50 = vsel %vm1009_vm9, %v1401_v23, %v1503_v25  ;;  %v1411_v4 = vsel %vm168_vm2, %v1323_v54, 0.0 }
 0x3d8   :  { %v1505_v27 = vsel %vm1011_vm10, %v1410_v24, %v1504_v50  ;;  %v1413_v16 = vadd.f32 %v1412_v5, %v1411_v4  ;;  %v1098_v24 = vunpack.c.h.bf16 %v70_v8  ;;  %v68_v50 = vld [vmem:[%s2521_s0 + $0x70] sm:$0xff]   ;;  %s1869_s0 = smov [#allocation2]  }
 0x3d9   :  { %1515 = vst.msk [vmem:[#allocation2] sm:$0xff] %vm168_vm2, %v1505_v27  ;;  %v1095_v34 = vunpack.c.l.bf16 %v68_v50  ;;  %v1096_v44 = vunpack.c.h.bf16 %v68_v50  ;;  %s1521_s14 = sshll.u32 %s1869_s0, 4  ;;  %s1522_s14 = int_to_ptr.vmem [resolvable:$true] %s1521_s14 }
 0x3da   :  { %v1414_v25 = vrot.slane %v1413_v16, 4 }
 0x3db   :  { %v1228_v29 = vpop.permute.xlu1 %1227 }
 0x3dc   :  { %v1326_v30 = vmul.f32 %v1228_v29, %v1086_v49  ;;  %v1415_v59 = vadd.f32 %v1414_v25, %v1413_v16 }
 0x3de   :  { %v1421_v14 = vsel %vm168_vm2, %v1326_v30, 0.0  ;;  %v1416_v30 = vrot.slane %v1415_v59, 2 }
 0x3df   :  { %v1422_v55 = vadd.f32 %v1421_v14, %v1420_v3 }
 0x3e0   :  { %v1417_v2 = vadd.f32 %v1416_v30, %v1415_v59 }
 0x3e1   :  { %v1423_v21 = vrot.slane %v1422_v55, 4 }
 0x3e3   :  { %v1287_v51 = vpop.permute.xlu2 %1286  ;;  %v1424_v31 = vadd.f32 %v1423_v21, %v1422_v55 }
 0x3e4   :  { %v1241_v42 = vpop.permute.xlu0 %1240 }
 0x3e5   :  { %v1328_v53 = vmul.f32 %v1241_v42, %v1088_v38  ;;  %v1425_v42 = vrot.slane %v1424_v31, 2 }
 0x3e7   :  { %v1430_v1 = vsel %vm168_vm2, %v1328_v53, 0.0 }
 0x3e8   :  { %v1431_v13 = vadd.f32 %v1430_v1, %v1429_v7 }
 0x3ea   :  { %v1432_v23 = vrot.slane %v1431_v13, 4 }
 0x3eb   :  { %v1248_v32 = vpop.permute.xlu1 %1247  ;;  %v1300_v22 = vpop.permute.xlu2 %1299 }
 0x3ec   :  { %v1329_v60 = vmul.f32 %v1248_v32, %v1089_v43  ;;  %v1337_v28 = vmul.f32 %v1300_v22, %v1097_v19  ;;  %v1433_v35 = vadd.f32 %v1432_v23, %v1431_v13 }
 0x3ee   :  { %v1438_v6 = vsel %vm168_vm2, %v1329_v60, 0.0  ;;  %v1474_v39 = vsel %vm168_vm2, %v1337_v28, 0.0  ;;  %v1426_v60 = vadd.f32 %v1425_v42, %v1424_v31 }
 0x3ef   :  { %v1440_v17 = vadd.f32 %v1439_v11, %v1438_v6 }
 0x3f0   :  { %v1427_v7 = vrot.slane %v1426_v60, 1 }
 0x3f1   :  { %v1441_v26 = vrot.slane %v1440_v17, 4 }
 0x3f3   :  { %v1261_v47 = vpop.permute.xlu1 %1260  ;;  %v1442_v49 = vadd.f32 %v1441_v26, %v1440_v17 }
 0x3f4   :  { %v1331_v63 = vmul.f32 %v1261_v47, %v1091_v45  ;;  %v1274_v9 = vpop.permute.xlu0 %1273  ;;  %v1434_v45 = vrot.slane %v1433_v35, 2  ;;  %v1335_v47 = vmul.f32 %v1287_v51, %v1095_v34 }
 0x3f5   :  { %v1333_v27 = vmul.f32 %v1274_v9, %v1093_v18  ;;  %v1443_v48 = vrot.slane %v1442_v49, 2 }
 0x3f6   :  { %v1447_v10 = vsel %vm168_vm2, %v1331_v63, 0.0  ;;  %v1435_v0 = vadd.f32 %v1434_v45, %v1433_v35  ;;  %v1465_v1 = vsel %vm168_vm2, %v1335_v47, 0.0 }
 0x3f7   :  { %v1449_v20 = vadd.f32 %v1448_v57, %v1447_v10  ;;  %v1456_v37 = vsel %vm168_vm2, %v1333_v27, 0.0  ;;  %v1444_v3 = vadd.f32 %v1443_v48, %v1442_v49  ;;  %v1418_v10 = vrot.slane %v1417_v2, 1 }
 0x3f8   :  { %v1436_v8 = vrot.slane %v1435_v0, 1  ;;  %v1428_v57 = vadd.f32 %v1427_v7, %v1426_v60 }
 0x3f9   :  { %v1450_v29 = vrot.slane %v1449_v20, 4  ;;  %v1445_v11 = vrot.slane %v1444_v3, 1 }
 0x3fa   :  { %v1437_v18 = vadd.f32 %v1436_v8, %v1435_v0 }
 0x3fb   :  { %v1451_v40 = vadd.f32 %v1450_v29, %v1449_v20  ;;  %v1419_v20 = vadd.f32 %v1418_v10, %v1417_v2  ;;  %v1446_v21 = vadd.f32 %v1445_v11, %v1444_v3 }
 0x3fd   :  { %v1452_v12 = vrot.slane %v1451_v40, 2  ;;  %v1506_v23 = vsel %vm999_vm4, %v1428_v57, %v1419_v20 }
 0x3fe   :  { %v1507_v50 = vsel %vm1001_vm5, %v1437_v18, %v1506_v23 }
 0x3ff   :  { %v1453_v5 = vadd.f32 %v1452_v12, %v1451_v40  ;;  %v1508_v27 = vsel %vm1003_vm6, %v1446_v21, %v1507_v50 }
 0x401   :  { %v1454_v13 = vrot.slane %v1453_v5, 1 }
 0x403   :  { %v1280_v61 = vpop.permute.xlu1 %1279  ;;  %v1455_v22 = vadd.f32 %v1454_v13, %v1453_v5 }
 0x404   :  { %v1306_v32 = vpop.permute.xlu0 %1305  ;;  %v1334_v33 = vmul.f32 %v1280_v61, %v1094_v52 }
 0x405   :  { %v1338_v36 = vmul.f32 %v1306_v32, %v1098_v24  ;;  %v1509_v28 = vsel %vm1005_vm7, %v1455_v22, %v1508_v27 }
 0x406   :  { %v1457_v38 = vsel %vm168_vm2, %v1334_v33, 0.0 }
 0x407   :  { %v1475_v41 = vsel %vm168_vm2, %v1338_v36, 0.0  ;;  %v1458_v58 = vadd.f32 %v1457_v38, %v1456_v37 }
 0x408   :  { %v1476_v43 = vadd.f32 %v1475_v41, %v1474_v39 }
 0x409   :  { %v1459_v46 = vrot.slane %v1458_v58, 4 }
 0x40a   :  { %v1477_v53 = vrot.slane %v1476_v43, 4 }
 0x40b   :  { %v1460_v54 = vadd.f32 %v1459_v46, %v1458_v58  ;;  %v1293_v56 = vpop.permute.xlu1 %1292 }
 0x40c   :  { %v1478_v62 = vadd.f32 %v1477_v53, %v1476_v43  ;;  %v1336_v63 = vmul.f32 %v1293_v56, %v1096_v44 }
 0x40d   :  { %v1461_v14 = vrot.slane %v1460_v54, 2 }
 0x40e   :  { %v1466_v4 = vsel %vm168_vm2, %v1336_v63, 0.0  ;;  %v1479_v51 = vrot.slane %v1478_v62, 2 }
 0x40f   :  { %v1467_v6 = vadd.f32 %v1466_v4, %v1465_v1  ;;  %v1462_v55 = vadd.f32 %v1461_v14, %v1460_v54 }
 0x410   :  { %v1480_v16 = vadd.f32 %v1479_v51, %v1478_v62 }
 0x411   :  { %v1468_v9 = vrot.slane %v1467_v6, 4  ;;  %v1463_v17 = vrot.slane %v1462_v55, 1 }
 0x412   :  { %v1481_v24 = vrot.slane %v1480_v16, 1 }
 0x413   :  { %v1469_v15 = vadd.f32 %v1468_v9, %v1467_v6  ;;  %v1464_v25 = vadd.f32 %v1463_v17, %v1462_v55 }
 0x414   :  { %v1482_v61 = vadd.f32 %v1481_v24, %v1480_v16 }
 0x415   :  { %v1470_v19 = vrot.slane %v1469_v15, 2  ;;  %v1510_v31 = vsel %vm1007_vm8, %v1464_v25, %v1509_v28 }
 0x417   :  { %v1471_v52 = vadd.f32 %v1470_v19, %v1469_v15 }
 0x419   :  { %v1472_v26 = vrot.slane %v1471_v52, 1 }
 0x41b   :  { %v1473_v29 = vadd.f32 %v1472_v26, %v1471_v52 }
 0x41d   :  { %v1511_v32 = vsel %vm1009_vm9, %v1473_v29, %v1510_v31 }
 0x41e   :  { %v1512_v33 = vsel %vm1011_vm10, %v1482_v61, %v1511_v32 }
 0x41f   :  { %1516 = vst.msk [vmem:[#allocation2 + $0x8] sm:$0xff] %vm168_vm2, %v1512_v33 }
 0x420   :  { %1529 = dma.vmem_to_hbm [thread:$0]  %s1522_s14, 256, %s1524_s9, [#allocation3], %s1867_s22, %s1867_s22, %s1868_s23  }
 0x421   :  { %1861 = dma.done.wait [#allocation3], 256  }
 0x422   :  { %1862 = vsyncadd [#allocation3], 4294967040 }
 0x423   :  { %1863 = dma.done.wait [#allocation5], 256  }
 0x424   :  { %1864 = vsyncadd [#allocation5], 4294967040 }
 0x425   :  { %1551 = vsyncpa [#allocation3], 1 }
 0x426   :  { %1552 = vsyncpa [#allocation5], 1 }

</bundles_post_ra>
